<compile_context>
chip_gen: v6e
topology: v6e:2x2x1
jax: 0.10.0
libtpu: 0.0.40
codegen_flags: <defaults>
</compile_context>

<pallas_src>
import functools
import math

import jax
import jax.numpy as jnp
from jax.experimental import pallas as pl
from jax.experimental.pallas import tpu as pltpu


# --------------------------------------------------------------------------- #
# Kernels
# --------------------------------------------------------------------------- #
def _dae_mse_single_kernel(masked_ref, orig_ref, w1_ref, b1_ref, w2_ref, b2_ref,
                           loss_ref, *, b_real, d_real, n_elems, mask_cols):
    """Fast path: everything resident in VMEM, one invocation, no grid.

    masked_ref: (B_pad, D_pad) bf16    orig_ref: (B_pad, D_pad) f32
    w1_ref: (D_pad, H_pad) bf16        b1_ref: (1, H_pad) f32
    w2_ref: (H_pad, D_pad) bf16        b2_ref: (1, D_pad) f32
    loss_ref: (1, 1) f32 in SMEM
    """
    h = jnp.dot(masked_ref[...], w1_ref[...], preferred_element_type=jnp.float32)
    h = jnp.maximum(h + b1_ref[...], 0.0)                       # encoder ReLU
    r = jnp.dot(h.astype(jnp.bfloat16), w2_ref[...],
                preferred_element_type=jnp.float32) + b2_ref[...]
    recon = 1.0 / (1.0 + jnp.exp(-r))                           # exact sigmoid
    diff = orig_ref[...] - recon
    row_ids = jax.lax.broadcasted_iota(jnp.int32, diff.shape, 0)
    diff = jnp.where(row_ids < b_real, diff, 0.0)               # padded batch rows
    if mask_cols:
        col_ids = jax.lax.broadcasted_iota(jnp.int32, diff.shape, 1)
        diff = jnp.where(col_ids < d_real, diff, 0.0)           # padded feature cols
    loss_ref[0, 0] = jnp.sum(diff * diff) * (1.0 / float(n_elems))


def _dae_mse_tiled_kernel(masked_ref, orig_ref, w1_ref, b1_ref, w2_ref, b2_ref,
                          loss_ref, h_acc, h_bf, sq_acc, *,
                          b_real, d_real, tk, n_elems, mask_cols):
    """Tiled path: 2-phase grid (phase, D-tile).

    phase 0: K-reduction over D tiles -> hidden pre-activation in h_acc (f32).
    phase 1: per-D-tile decoder matmul + sigmoid + masked squared error into
             sq_acc (f32 VMEM); the single reduce + 1/n scale happens on the
             last step.
    """
    p = pl.program_id(0)          # 0 = encoder K-reduction, 1 = decoder + MSE
    k = pl.program_id(1)
    nk = pl.num_programs(1)

    # ---- phase 0, first tile: zero the hidden accumulator --------------------
    @pl.when(jnp.logical_and(p == 0, k == 0))
    def _():
        h_acc[...] = jnp.zeros_like(h_acc)

    # ---- phase 0: accumulate hidden pre-activation over D tiles --------------
    @pl.when(p == 0)
    def _():
        h_acc[...] += jnp.dot(masked_ref[...], w1_ref[...],
                              preferred_element_type=jnp.float32)

    # ---- phase boundary: bias + ReLU, single bf16 cast, zero the sq accumulator
    @pl.when(jnp.logical_and(p == 1, k == 0))
    def _():
        h = jnp.maximum(h_acc[...] + b1_ref[...], 0.0)
        h_bf[...] = h.astype(jnp.bfloat16)          # cast once, reuse every D tile
        sq_acc[...] = jnp.zeros_like(sq_acc)

    # ---- phase 1: decoder tile + sigmoid + masked squared-error --------------
    @pl.when(p == 1)
    def _():
        r = jnp.dot(h_bf[...], w2_ref[...],
                    preferred_element_type=jnp.float32) + b2_ref[...]
        recon = 1.0 / (1.0 + jnp.exp(-r))                       # exact sigmoid
        diff = orig_ref[...] - recon
        row_ids = jax.lax.broadcasted_iota(jnp.int32, diff.shape, 0)
        diff = jnp.where(row_ids < b_real, diff, 0.0)
        if mask_cols:
            col_ids = jax.lax.broadcasted_iota(jnp.int32, diff.shape, 1) + k * tk
            diff = jnp.where(col_ids < d_real, diff, 0.0)
        sq_acc[...] += diff * diff                  # pure VPU add, no per-step reduce

    # ---- finalize: single reduce + mean over the real (unpadded) elements ----
    @pl.when(jnp.logical_and(p == 1, k == nk - 1))
    def _():
        loss_ref[0, 0] = jnp.sum(sq_acc[...]) * (1.0 / float(n_elems))


# --------------------------------------------------------------------------- #
# Wrapper helpers
# --------------------------------------------------------------------------- #
def _tpu_vmem_bytes(default=64 << 20):
    """Best-effort query of per-core VMEM capacity; safe fallback if unavailable."""
    try:
        info = pltpu.get_tpu_info()
        for attr in ("vmem_capacity_bytes", "vmem_bytes", "vmem_size_bytes"):
            v = getattr(info, attr, None)
            if v:
                return int(v)
    except Exception:
        pass
    return default


def _budgets():
    """Per-generation tile / VMEM budgets for the tiled path."""
    vmem_cap = _tpu_vmem_bytes()
    if vmem_cap >= (96 << 20):
        # v5e / v6e: 128 MiB VMEM -> big tiles, generous scoped limit.
        return dict(vmem_cap=vmem_cap, tile_budget=12 << 20, max_tk=2048,
                    vmem_limit=96 << 20)
    # v7x-class: 64 MiB physical -> keep double-buffered w1+w2 tiles well under it.
    return dict(vmem_cap=vmem_cap, tile_budget=6 << 20, max_tk=1024,
                vmem_limit=48 << 20)


def _pick_tile_d(d_pad, hidden, max_tk, tile_bytes_budget):
    """Largest multiple-of-128 divisor of d_pad (<= max_tk) whose bf16 weight
    tile fits the per-tile byte budget.  d_pad is always a multiple of 128."""
    best = 128
    for cand in range(128, min(d_pad, max_tk) + 1, 128):
        if d_pad % cand == 0 and cand * hidden * 2 <= tile_bytes_budget:
            best = cand
    return best


def _round_up(x, m):
    return ((x + m - 1) // m) * m


# --------------------------------------------------------------------------- #
# Public entry point (== MainModel.forward)
# --------------------------------------------------------------------------- #
def autoencoder_mse_loss(masked_img, original_img, w1, b1, w2, b2):
    """masked_img / original_img: (B, C, H, W) NCHW, like the PyTorch module."""
    B = masked_img.shape[0]
    D = math.prod(masked_img.shape[1:])
    hidden = w1.shape[1]

    # Layout padding: 16 sublanes (bf16 packing) x 128-lane-aligned feature dim.
    B_pad = max(16, _round_up(B, 16))
    D_pad = _round_up(D, 128)
    H_pad = _round_up(hidden, 128)
    mask_cols = D_pad != D
    n_elems = B * D

    masked_flat = masked_img.reshape(B, D).astype(jnp.float32)
    orig_flat = original_img.reshape(B, D).astype(jnp.float32)
    w1f = w1.astype(jnp.float32)
    b1f = b1.astype(jnp.float32)
    w2f = w2.astype(jnp.float32)
    b2f = b2.astype(jnp.float32)

    if B_pad != B:
        masked_flat = jnp.pad(masked_flat, ((0, B_pad - B), (0, 0)))
        orig_flat = jnp.pad(orig_flat, ((0, B_pad - B), (0, 0)))
    if D_pad != D:
        masked_flat = jnp.pad(masked_flat, ((0, 0), (0, D_pad - D)))
        orig_flat = jnp.pad(orig_flat, ((0, 0), (0, D_pad - D)))
        w1f = jnp.pad(w1f, ((0, D_pad - D), (0, 0)))
        w2f = jnp.pad(w2f, ((0, 0), (0, D_pad - D)))
        b2f = jnp.pad(b2f, ((0, D_pad - D),))
    if H_pad != hidden:
        w1f = jnp.pad(w1f, ((0, 0), (0, H_pad - hidden)))
        b1f = jnp.pad(b1f, ((0, H_pad - hidden),))
        w2f = jnp.pad(w2f, ((0, H_pad - hidden), (0, 0)))

    # bf16 operands for the MXU; f32 accumulation + f32 elementwise epilogue.
    masked_bf = masked_flat.astype(jnp.bfloat16)
    w1_bf = w1f.astype(jnp.bfloat16)
    w2_bf = w2f.astype(jnp.bfloat16)
    b1_2d = b1f.reshape(1, H_pad)
    b2_2d = b2f.reshape(1, D_pad)

    budgets = _budgets()

    cost = pl.CostEstimate(
        flops=4 * B_pad * D_pad * H_pad,          # two matmuls
        transcendentals=B_pad * D_pad,            # exp in sigmoid
        bytes_accessed=(2 * D_pad * H_pad * 2     # bf16 w1 + w2 streamed
                        + B_pad * D_pad * 2       # bf16 masked input
                        + B_pad * D_pad * 4       # f32 original input
                        + 4 * (H_pad + D_pad) + 4))

    # ---------------- fast path: single invocation, no grid -------------------
    resident_bytes = (2 * D_pad * H_pad * 2           # w1 + w2 bf16
                      + B_pad * D_pad * (2 + 4)       # masked bf16 + orig f32
                      + 4 * (H_pad + D_pad)           # biases
                      + 2 * B_pad * (H_pad + D_pad) * 4)  # activation headroom
    fast_budget = min(budgets["vmem_cap"] // 4, 16 << 20)

    if resident_bytes <= fast_budget:
        kernel = functools.partial(
            _dae_mse_single_kernel,
            b_real=B, d_real=D, n_elems=n_elems, mask_cols=mask_cols)
        loss = pl.pallas_call(
            kernel,
            out_shape=jax.ShapeDtypeStruct((1, 1), jnp.float32),
            in_specs=[pl.BlockSpec(memory_space=pltpu.MemorySpace.VMEM)] * 6,
            out_specs=pl.BlockSpec(memory_space=pltpu.MemorySpace.SMEM),
            compiler_params=pltpu.CompilerParams(
                vmem_limit_bytes=min(budgets["vmem_limit"], 32 << 20)),
            cost_estimate=cost,
        )(masked_bf, orig_flat, w1_bf, b1_2d, w2_bf, b2_2d)
        return loss[0, 0]

    # ---------------- tiled path: 2-phase grid, streamed weight tiles ---------
    tk = _pick_tile_d(D_pad, H_pad, budgets["max_tk"], budgets["tile_budget"])
    nk = D_pad // tk
    grid = (2, nk)   # (phase, D-tile); D-reduction/stream is the fastest axis

    kernel = functools.partial(
        _dae_mse_tiled_kernel,
        b_real=B, d_real=D, tk=tk, n_elems=n_elems, mask_cols=mask_cols)

    loss = pl.pallas_call(
        kernel,
        out_shape=jax.ShapeDtypeStruct((1, 1), jnp.float32),
        grid_spec=pltpu.PrefetchScalarGridSpec(
            num_scalar_prefetch=0,
            grid=grid,
            in_specs=[
                # masked image tile: streamed in phase 0; in phase 1 the index
                # HOLDS the last-used block (nk-1) so no wasted re-DMA.
                pl.BlockSpec((B_pad, tk),
                             lambda p, k: (0, (1 - p) * k + p * (nk - 1))),
                # original image tile: block 0 prefetched during phase 0, then
                # streamed through phase 1.
                pl.BlockSpec((B_pad, tk), lambda p, k: (0, p * k)),
                # encoder weight tile (tk, H_pad): streamed in phase 0, held at
                # its last block through phase 1 (no re-DMA).
                pl.BlockSpec((tk, H_pad),
                             lambda p, k: ((1 - p) * k + p * (nk - 1), 0)),
                # encoder bias (resident)
                pl.BlockSpec((1, H_pad), lambda p, k: (0, 0)),
                # decoder weight tile (H_pad, tk): block 0 prefetched in phase 0,
                # streamed in phase 1.
                pl.BlockSpec((H_pad, tk), lambda p, k: (0, p * k)),
                # decoder bias tile
                pl.BlockSpec((1, tk), lambda p, k: (0, p * k)),
            ],
            out_specs=pl.BlockSpec((1, 1), lambda p, k: (0, 0),
                                   memory_space=pltpu.MemorySpace.SMEM),
            scratch_shapes=[
                pltpu.VMEM((B_pad, H_pad), jnp.float32),   # hidden accumulator
                pltpu.VMEM((B_pad, H_pad), jnp.bfloat16),  # hidden, cast once
                pltpu.VMEM((B_pad, tk), jnp.float32),      # squared-error acc
            ],
        ),
        compiler_params=pltpu.CompilerParams(
            # Both axes are phases/reductions -> no independent axis to mark
            # "parallel" in this design (see TODO at top for the v7x split).
            dimension_semantics=("arbitrary", "arbitrary"),
            vmem_limit_bytes=budgets["vmem_limit"]),
        cost_estimate=cost,
    )(masked_bf, orig_flat, w1_bf, b1_2d, w2_bf, b2_2d)
    return loss[0, 0]


# --------------------------------------------------------------------------- #
# Parameter init (PyTorch nn.Linear default: U(-1/sqrt(fan_in), 1/sqrt(fan_in)))
# --------------------------------------------------------------------------- #
def init_params(key, d_in, hidden):
    k1, k2, k3, k4 = jax.random.split(key, 4)
    bound1 = 1.0 / jnp.sqrt(jnp.float32(d_in))
    bound2 = 1.0 / jnp.sqrt(jnp.float32(hidden))
    w1 = jax.random.uniform(k1, (d_in, hidden), jnp.float32, -bound1, bound1)
    b1 = jax.random.uniform(k2, (hidden,), jnp.float32, -bound1, bound1)
    w2 = jax.random.uniform(k3, (hidden, d_in), jnp.float32, -bound2, bound2)
    b2 = jax.random.uniform(k4, (d_in,), jnp.float32, -bound2, bound2)
    return w1, b1, w2, b2


if __name__ == "__main__":
    key = jax.random.PRNGKey(0)
    k_img, k_mask, k_params = jax.random.split(key, 3)

    B, C, H, W = 2, 4, 16, 16        # NCHW, matching the PyTorch convention
    HIDDEN = 256
    D = C * H * W

    original_img = jax.random.uniform(k_img, (B, C, H, W), jnp.float32)
    # Masked (noised) version of the original image.
    mask = (jax.random.uniform(k_mask, (B, C, H, W), jnp.float32) > 0.25)
    masked_img = original_img * mask.astype(jnp.float32)

    w1, b1, w2, b2 = init_params(k_params, D, HIDDEN)

    loss = autoencoder_mse_loss(masked_img, original_img, w1, b1, w2, b2)
    jax.block_until_ready(loss)

    # Pure-JAX reference with the same bf16 matmul inputs / f32 accumulation.
    x_bf = masked_img.reshape(B, D).astype(jnp.bfloat16)
    h_ref = jnp.maximum(
        jnp.dot(x_bf, w1.astype(jnp.bfloat16),
                preferred_element_type=jnp.float32) + b1, 0.0)
    r_ref = jnp.dot(h_ref.astype(jnp.bfloat16), w2.astype(jnp.bfloat16),
                    preferred_element_type=jnp.float32) + b2
    recon_ref = jax.nn.sigmoid(r_ref)
    loss_ref = jnp.mean((original_img.reshape(B, D) - recon_ref) ** 2)

    # Exact sigmoid in-kernel -> tight tolerance; residual slack only for
    # f32 summation-order differences.
    assert jnp.allclose(loss, loss_ref, rtol=2e-3, atol=1e-6), (loss, loss_ref)

    print("KERNEL_OK")
</pallas_src>

<mosaic_0001>
module attributes {stable_mosaic.version = 11 : i64} {
  func.func @_dae_mse_single_kernel(%arg0: memref<16x1024xbf16, #tpu.memory_space<vmem>>, %arg1: memref<16x1024xf32, #tpu.memory_space<vmem>>, %arg2: memref<1024x256xbf16, #tpu.memory_space<vmem>>, %arg3: memref<1x256xf32, #tpu.memory_space<vmem>>, %arg4: memref<256x1024xbf16, #tpu.memory_space<vmem>>, %arg5: memref<1x1024xf32, #tpu.memory_space<vmem>>, %arg6: memref<1x1xf32, #tpu.memory_space<smem>>) attributes {dimension_semantics = [], scalar_prefetch = 0 : i64, scratch_operands = 0 : i64, tpu.core_type = #tpu.core_type<tc>} {
    %c0 = arith.constant 0 : index
    %c0_0 = arith.constant 0 : index
    %0 = vector.load %arg0[%c0, %c0_0] : memref<16x1024xbf16, #tpu.memory_space<vmem>>, vector<16x1024xbf16>
    %c0_1 = arith.constant 0 : index
    %c0_2 = arith.constant 0 : index
    %1 = vector.load %arg2[%c0_1, %c0_2] : memref<1024x256xbf16, #tpu.memory_space<vmem>>, vector<1024x256xbf16>
    %cst = arith.constant dense<0.000000e+00> : vector<16x256xf32>
    %2 = tpu.matmul %0, %1, %cst {dimension_numbers = #tpu.dot_dimension_numbers<[1], [0], [0], [1], [0, 0, 1, 1], [], []>} : vector<16x1024xbf16>, vector<1024x256xbf16>, vector<16x256xf32> -> vector<16x256xf32>
    %c0_3 = arith.constant 0 : index
    %c0_4 = arith.constant 0 : index
    %3 = vector.load %arg3[%c0_3, %c0_4] : memref<1x256xf32, #tpu.memory_space<vmem>>, vector<1x256xf32>
    %4 = vector.broadcast %3 : vector<1x256xf32> to vector<16x256xf32>
    %5 = arith.addf %2, %4 : vector<16x256xf32>
    %cst_5 = arith.constant 0.000000e+00 : f32
    %6 = vector.broadcast %cst_5 : f32 to vector<16x256xf32>
    %7 = arith.maximumf %5, %6 : vector<16x256xf32>
    %8 = arith.truncf %7 : vector<16x256xf32> to vector<16x256xbf16>
    %c0_6 = arith.constant 0 : index
    %c0_7 = arith.constant 0 : index
    %9 = vector.load %arg4[%c0_6, %c0_7] : memref<256x1024xbf16, #tpu.memory_space<vmem>>, vector<256x1024xbf16>
    %cst_8 = arith.constant dense<0.000000e+00> : vector<16x1024xf32>
    %10 = tpu.matmul %8, %9, %cst_8 {dimension_numbers = #tpu.dot_dimension_numbers<[1], [0], [0], [1], [0, 0, 1, 1], [], []>} : vector<16x256xbf16>, vector<256x1024xbf16>, vector<16x1024xf32> -> vector<16x1024xf32>
    %c0_9 = arith.constant 0 : index
    %c0_10 = arith.constant 0 : index
    %11 = vector.load %arg5[%c0_9, %c0_10] : memref<1x1024xf32, #tpu.memory_space<vmem>>, vector<1x1024xf32>
    %12 = vector.broadcast %11 : vector<1x1024xf32> to vector<16x1024xf32>
    %13 = arith.addf %10, %12 : vector<16x1024xf32>
    %cst_11 = arith.constant 0.000000e+00 : f32
    %14 = vector.broadcast %cst_11 : f32 to vector<16x1024xf32>
    %15 = arith.subf %14, %13 : vector<16x1024xf32>
    %16 = math.exp %15 : vector<16x1024xf32>
    %cst_12 = arith.constant 1.000000e+00 : f32
    %17 = vector.broadcast %cst_12 : f32 to vector<16x1024xf32>
    %18 = arith.addf %17, %16 : vector<16x1024xf32>
    %cst_13 = arith.constant 1.000000e+00 : f32
    %19 = vector.broadcast %cst_13 : f32 to vector<16x1024xf32>
    %20 = arith.divf %19, %18 : vector<16x1024xf32>
    %c0_14 = arith.constant 0 : index
    %c0_15 = arith.constant 0 : index
    %21 = vector.load %arg1[%c0_14, %c0_15] : memref<16x1024xf32, #tpu.memory_space<vmem>>, vector<16x1024xf32>
    %22 = arith.subf %21, %20 : vector<16x1024xf32>
    %23 = tpu.iota {dimensions = array<i32: 0>} : vector<16x1024xi32>
    %c2_i32 = arith.constant 2 : i32
    %24 = vector.broadcast %c2_i32 : i32 to vector<16x1024xi32>
    %25 = arith.cmpi slt, %23, %24 : vector<16x1024xi32>
    %cst_16 = arith.constant 0.000000e+00 : f32
    %26 = vector.broadcast %cst_16 : f32 to vector<16x1024xf32>
    %27 = arith.select %25, %22, %26 : vector<16x1024xi1>, vector<16x1024xf32>
    %28 = arith.mulf %27, %27 : vector<16x1024xf32>
    %29 = vector.shape_cast %28 : vector<16x1024xf32> to vector<1x16x1024xf32>
    %cst_17 = arith.constant dense<0.000000e+00> : vector<1xf32>
    %30 = vector.multi_reduction <add>, %29, %cst_17 [1, 2] : vector<1x16x1024xf32> to vector<1xf32>
    %31 = vector.shape_cast %30 : vector<1xf32> to vector<1x1x1xf32>
    %32 = vector.extract %31[0, 0, 0] : f32 from vector<1x1x1xf32>
    %cst_18 = arith.constant 4.8828125E-4 : f32
    %33 = arith.mulf %32, %cst_18 : f32
    %c0_19 = arith.constant 0 : index
    %c0_20 = arith.constant 0 : index
    %34 = memref.load %arg6[%c0_19, %c0_20] : memref<1x1xf32, #tpu.memory_space<smem>>
    memref.store %33, %arg6[%c0_19, %c0_20] : memref<1x1xf32, #tpu.memory_space<smem>>
    return
  }
}

</mosaic_0001>

<bundles_post_ra>
// kernel: tpu_custom_call.1
= control target key start
LH: loop header
LB: loop body
LE: loop exit
PB: predicated region body
PF: predicated region fallthrough
CT: control target
= control target key end

     0   :  { %11 = vsyncpa [#allocation3], 0  ;;  %s3051_s0 = inlined_call_operand.hbm [shape: bf16[16,1024], index: 0, kind: input, shape index: {}]   ;;  %s3052_s1 = inlined_call_operand.hbm [shape: f32[16,1024], index: 1, kind: input, shape index: {}]   ;;  %s3053_s2 = inlined_call_operand.hbm [shape: bf16[1024,256], index: 2, kind: input, shape index: {}]   ;;  %s3054_s3 = inlined_call_operand.hbm [shape: f32[1,256], index: 3, kind: input, shape index: {}]   ;;  %s3055_s4 = inlined_call_operand.hbm [shape: bf16[256,1024], index: 4, kind: input, shape index: {}]   ;;  %s3056_s5 = inlined_call_operand.vmem [shape: f32[1,1024], index: 5, kind: input, shape index: {}]   ;;  %s3057_s6 = inlined_call_operand.hbm [shape: f32[1,1], index: 6, kind: output, shape index: {}]  }
   0x1   :  { %12 = vsyncpa [#allocation6], 0 }
   0x2   :  { %13 = vsyncpa [#allocation9], 0 }
   0x3   :  { %14 = vsyncpa [#allocation4], 0  ;;  %s2904_s21 = smov [#allocation5]  }
   0x4   :  { %s32_s22 = sshll.u32 %s2904_s21, 4  ;;  %s33_s22 = int_to_ptr.vmem [resolvable:$true] %s32_s22 }
   0x5   :  { %s2796_s23 = scalar_lea.vmem %s33_s22, 2048  ;;  %p2801_p1 = scmp.lt.s32.totalorder %s33_s22, %s33_s22 }
   0x6   :  { %p2797_p0 = scmp.ne.s32.totalorder %s33_s22, %s2796_s23  ;;  %p2802_p2 = scmp.lt.s32.totalorder %s2796_s23, %s2796_s23 }
   0x8   :  { %p2803_p3 = por %p2802_p2, %p2801_p1 }
   0xa   :  { %p2804_p4 = pnand %p2803_p3, %p2797_p0 }
   0xc   :  { %2807 = shalt.err (!%p2804_p4)
}
   0xd   :  { %s2905_s24 = smov 1024   ;;  %s2906_s25 = smov 64  }
   0xe   :  { %38 = dma.hbm_to_vmem [thread:$0]  %s3052_s1, 2048, %s33_s22, [#allocation6], %s2905_s24, %s2905_s24, %s2906_s25  }
   0xf   :  { %s2907_s28 = smov [#allocation8]   ;;  %s2908_s30 = smov [#allocation2]  }
  0x10   :  { %s57_s29 = sshll.u32 %s2907_s28, 4  ;;  %s20_s7 = sshll.u32 %s2908_s30, 4  ;;  %s58_s29 = int_to_ptr.vmem [resolvable:$true] %s57_s29  ;;  %s21_s7 = int_to_ptr.vmem [resolvable:$true] %s20_s7 }
  0x11   :  { %s2816_s8 = scalar_lea.vmem %s58_s29, 32  ;;  %p2821_p6 = scmp.lt.s32.totalorder %s58_s29, %s58_s29 }
  0x12   :  { %p2817_p5 = scmp.ne.s32.totalorder %s58_s29, %s2816_s8  ;;  %p2822_p7 = scmp.lt.s32.totalorder %s2816_s8, %s2816_s8 }
  0x14   :  { %p2823_p8 = por %p2822_p7, %p2821_p6 }
  0x16   :  { %p2824_p9 = pnand %p2823_p8, %p2817_p5 }
  0x18   :  { %2827 = shalt.err (!%p2824_p9)
}
  0x19   :  { %60 = dma.hbm_to_vmem [thread:$0]  %s3054_s3, 32, %s58_s29, [#allocation9]  }
  0x1a   :  { %s2836_s11 = scalar_lea.vmem %s21_s7, 1024  ;;  %p2841_p11 = scmp.lt.s32.totalorder %s21_s7, %s21_s7 }
  0x1b   :  { %p2837_p10 = scmp.ne.s32.totalorder %s21_s7, %s2836_s11  ;;  %p2842_p12 = scmp.lt.s32.totalorder %s2836_s11, %s2836_s11 }
  0x1d   :  { %p2843_p13 = por %p2842_p12, %p2841_p11 }
  0x1f   :  { %p2844_p0 = pnand %p2843_p13, %p2837_p10 }
  0x21   :  { %2847 = shalt.err (!%p2844_p0)
}
  0x22   :  { %s2909_s1 = smov 512   ;;  %s2910_s12 = smov 32  }
  0x23   :  { %26 = dma.hbm_to_vmem [thread:$0]  %s3051_s0, 1024, %s21_s7, [#allocation3], %s2909_s1, %s2909_s1, %s2910_s12  }
  0x24   :  { %s2911_s15 = smov [#allocation7]  }
  0x25   :  { %s44_s16 = sshll.u32 %s2911_s15, 4  ;;  %s45_s16 = int_to_ptr.vmem [resolvable:$true] %s44_s16 }
  0x26   :  { %s2856_s17 = scalar_lea.vmem %s45_s16, 16384  ;;  %p2861_p2 = scmp.lt.s32.totalorder %s45_s16, %s45_s16 }
  0x27   :  { %p2857_p1 = scmp.ne.s32.totalorder %s45_s16, %s2856_s17  ;;  %p2862_p3 = scmp.lt.s32.totalorder %s2856_s17, %s2856_s17 }
  0x29   :  { %p2863_p4 = por %p2862_p3, %p2861_p2 }
  0x2b   :  { %p2864_p5 = pnand %p2863_p4, %p2857_p1 }
  0x2d   :  { %2867 = shalt.err (!%p2864_p5)
}
  0x2e   :  { %s2912_s3 = smov 128   ;;  %s2913_s18 = smov 8  }
  0x2f   :  { %50 = dma.hbm_to_vmem [thread:$0]  %s3053_s2, 16384, %s45_s16, [#allocation6], %s2912_s3, %s2912_s3, %s2913_s18  }
  0x30   :  { %s2914_s21 = smov [#allocation10]  }
  0x31   :  { %s66_s22 = sshll.u32 %s2914_s21, 4  ;;  %s67_s22 = int_to_ptr.vmem [resolvable:$true] %s66_s22 }
  0x32   :  { %s2876_s0 = scalar_lea.vmem %s67_s22, 16384  ;;  %p2881_p7 = scmp.lt.s32.totalorder %s67_s22, %s67_s22 }
  0x33   :  { %p2877_p6 = scmp.ne.s32.totalorder %s67_s22, %s2876_s0  ;;  %p2882_p8 = scmp.lt.s32.totalorder %s2876_s0, %s2876_s0 }
  0x35   :  { %p2883_p9 = por %p2882_p8, %p2881_p7 }
  0x37   :  { %p2884_p10 = pnand %p2883_p9, %p2877_p6 }
  0x39   :  { %2887 = shalt.err (!%p2884_p10)
}
  0x3a   :  { %72 = dma.hbm_to_vmem [thread:$0]  %s3055_s4, 16384, %s67_s22, [#allocation9], %s2909_s1, %s2909_s1, %s2910_s12  }
  0x3b   :  { %2896 = dma.done.wait [#allocation3], 1024  }
  0x3c   :  { %2897 = vsyncadd [#allocation3], 4294966272 }
  0x3d   :  { %2898 = dma.done.wait [#allocation6], 18432  }
  0x3e   :  { %2899 = vsyncadd [#allocation6], 4294948864 }
  0x3f   :  { %2900 = dma.done.wait [#allocation9], 16416  }
  0x40   :  { %2901 = vsyncadd [#allocation9], 4294950880  ;;  %v2564_v0 = vld [vmem:[#allocation7 + $0x74] ss:$8 sps:$4 sm:$0xff]   ;;  %v2568_v2 = vld [vmem:[#allocation7 + $0x70] ss:$8 sps:$4 sm:$0xff]  }
  0x41   :  { %v2566_v1 = vld [vmem:[#allocation7 + $0x174] ss:$8 sps:$4 sm:$0xff]   ;;  %918 = vmatprep.subr.bf16.mxu0 %v2564_v0  ;;  %v2569_v3 = vld [vmem:[#allocation7 + $0x170] ss:$8 sps:$4 sm:$0xff]   ;;  %v2570_v4 = vld [vmem:[#allocation7 + $0x64] ss:$8 sps:$4 sm:$0xff]  }
  0x42   :  { %961 = vmatprep.subr.bf16.mxu1 %v2566_v1  ;;  %919 = vmatpush1.bf16.msra.mxu0 %v2568_v2  ;;  %v2572_v5 = vld [vmem:[#allocation7 + $0x164] ss:$8 sps:$4 sm:$0xff]   ;;  %v2574_v6 = vld [vmem:[#allocation7 + $0x60] ss:$8 sps:$4 sm:$0xff]   ;;  %v2576_v8 = vld [vmem:[#allocation7 + $0x54] ss:$8 sps:$4 sm:$0xff]  }
  0x43   :  { %962 = vmatpush1.bf16.msra.mxu1 %v2569_v3  ;;  %920 = vmatprep.subr.bf16.mxu0 %v2570_v4  ;;  %v2575_v7 = vld [vmem:[#allocation7 + $0x160] ss:$8 sps:$4 sm:$0xff]   ;;  %v2578_v9 = vld [vmem:[#allocation7 + $0x154] ss:$8 sps:$4 sm:$0xff]   ;;  %v2580_v10 = vld [vmem:[#allocation7 + $0x50] ss:$8 sps:$4 sm:$0xff]  }
  0x44   :  { %963 = vmatprep.subr.bf16.mxu1 %v2572_v5  ;;  %v2581_v11 = vld [vmem:[#allocation7 + $0x150] ss:$8 sps:$4 sm:$0xff]   ;;  %v2582_v12 = vld [vmem:[#allocation7 + $0x44] ss:$8 sps:$4 sm:$0xff]   ;;  %v2586_v14 = vld [vmem:[#allocation7 + $0x40] ss:$8 sps:$4 sm:$0xff]  }
  0x45   :  { %v2584_v13 = vld [vmem:[#allocation7 + $0x144] ss:$8 sps:$4 sm:$0xff]   ;;  %v2587_v15 = vld [vmem:[#allocation7 + $0x140] ss:$8 sps:$4 sm:$0xff]   ;;  %v2588_v16 = vld [vmem:[#allocation7 + $0x34] ss:$8 sps:$4 sm:$0xff]  }
  0x46   :  { %921 = vmatpush1.bf16.msra.mxu0 %v2574_v6  ;;  %v2590_v17 = vld [vmem:[#allocation7 + $0x134] ss:$8 sps:$4 sm:$0xff]   ;;  %v2592_v18 = vld [vmem:[#allocation7 + $0x30] ss:$8 sps:$4 sm:$0xff]   ;;  %v2594_v20 = vld [vmem:[#allocation7 + $0x24] ss:$8 sps:$4 sm:$0xff]  }
  0x47   :  { %964 = vmatpush1.bf16.msra.mxu1 %v2575_v7  ;;  %922 = vmatprep.subr.bf16.mxu0 %v2576_v8  ;;  %v2593_v19 = vld [vmem:[#allocation7 + $0x130] ss:$8 sps:$4 sm:$0xff]   ;;  %v2596_v21 = vld [vmem:[#allocation7 + $0x124] ss:$8 sps:$4 sm:$0xff]   ;;  %v2598_v22 = vld [vmem:[#allocation7 + $0x20] ss:$8 sps:$4 sm:$0xff]  }
  0x48   :  { %965 = vmatprep.subr.bf16.mxu1 %v2578_v9  ;;  %v2599_v23 = vld [vmem:[#allocation7 + $0x120] ss:$8 sps:$4 sm:$0xff]   ;;  %v2600_v24 = vld [vmem:[#allocation7 + $0x14] ss:$8 sps:$4 sm:$0xff]   ;;  %v2604_v26 = vld [vmem:[#allocation7 + $0x10] ss:$8 sps:$4 sm:$0xff]  }
  0x49   :  { %v2602_v25 = vld [vmem:[#allocation7 + $0x114] ss:$8 sps:$4 sm:$0xff]   ;;  %v2605_v27 = vld [vmem:[#allocation7 + $0x110] ss:$8 sps:$4 sm:$0xff]   ;;  %v2606_v28 = vld [vmem:[#allocation7 + $0x4] ss:$8 sps:$4 sm:$0xff]  }
  0x4a   :  { %923 = vmatpush1.bf16.msra.mxu0 %v2580_v10  ;;  %v2608_v29 = vld [vmem:[#allocation7 + $0x104] ss:$8 sps:$4 sm:$0xff]   ;;  %v2610_v30 = vld [vmem:[#allocation7] ss:$8 sps:$4 sm:$0xff]   ;;  %v2612_v32 = vld [vmem:[#allocation7 + $0xf4] ss:$8 sps:$4 sm:$0xff]  }
  0x4b   :  { %966 = vmatpush1.bf16.msra.mxu1 %v2581_v11  ;;  %924 = vmatprep.subr.bf16.mxu0 %v2582_v12  ;;  %v2611_v31 = vld [vmem:[#allocation7 + $0x100] ss:$8 sps:$4 sm:$0xff]   ;;  %v2614_v33 = vld [vmem:[#allocation7 + $0x1f4] ss:$8 sps:$4 sm:$0xff]   ;;  %v2616_v34 = vld [vmem:[#allocation7 + $0xf0] ss:$8 sps:$4 sm:$0xff]  }
  0x4c   :  { %967 = vmatprep.subr.bf16.mxu1 %v2584_v13  ;;  %v2617_v35 = vld [vmem:[#allocation7 + $0x1f0] ss:$8 sps:$4 sm:$0xff]   ;;  %v2618_v36 = vld [vmem:[#allocation7 + $0xe4] ss:$8 sps:$4 sm:$0xff]   ;;  %v2622_v38 = vld [vmem:[#allocation7 + $0xe0] ss:$8 sps:$4 sm:$0xff]  }
  0x4d   :  { %v2620_v37 = vld [vmem:[#allocation7 + $0x1e4] ss:$8 sps:$4 sm:$0xff]   ;;  %v2623_v39 = vld [vmem:[#allocation7 + $0x1e0] ss:$8 sps:$4 sm:$0xff]   ;;  %v2624_v40 = vld [vmem:[#allocation7 + $0xd4] ss:$8 sps:$4 sm:$0xff]  }
  0x4e   :  { %925 = vmatpush1.bf16.msra.mxu0 %v2586_v14  ;;  %v2626_v41 = vld [vmem:[#allocation7 + $0x1d4] ss:$8 sps:$4 sm:$0xff]   ;;  %v2628_v42 = vld [vmem:[#allocation7 + $0xd0] ss:$8 sps:$4 sm:$0xff]   ;;  %v2630_v44 = vld [vmem:[#allocation7 + $0xc4] ss:$8 sps:$4 sm:$0xff]  }
  0x4f   :  { %968 = vmatpush1.bf16.msra.mxu1 %v2587_v15  ;;  %926 = vmatprep.subr.bf16.mxu0 %v2588_v16  ;;  %v2629_v43 = vld [vmem:[#allocation7 + $0x1d0] ss:$8 sps:$4 sm:$0xff]   ;;  %v2632_v45 = vld [vmem:[#allocation7 + $0x1c4] ss:$8 sps:$4 sm:$0xff]   ;;  %v2634_v46 = vld [vmem:[#allocation7 + $0xc0] ss:$8 sps:$4 sm:$0xff]  }
  0x50   :  { %969 = vmatprep.subr.bf16.mxu1 %v2590_v17  ;;  %v2635_v47 = vld [vmem:[#allocation7 + $0x1c0] ss:$8 sps:$4 sm:$0xff]   ;;  %v2636_v52 = vld [vmem:[#allocation7 + $0xb4] ss:$8 sps:$4 sm:$0xff]   ;;  %v2640_v56 = vld [vmem:[#allocation7 + $0xb0] ss:$8 sps:$4 sm:$0xff]  }
  0x51   :  { %v90_v48 = vld [vmem:[#allocation2] sm:$0xff]  ;;  %v91_v50 = vld [vmem:[#allocation2 + $0x8] sm:$0xff]  ;;  %v2638_v54 = vld [vmem:[#allocation7 + $0x1b4] ss:$8 sps:$4 sm:$0xff]   ;;  %s2915_s26 = smov [#allocation11]  }
  0x52   :  { %927 = vmatpush1.bf16.msra.mxu0 %v2592_v18  ;;  %v94_v49 = vld [vmem:[#allocation2 + $0x20] sm:$0xff]  ;;  %v95_v51 = vld [vmem:[#allocation2 + $0x28] sm:$0xff]  ;;  %v2641_v57 = vld [vmem:[#allocation7 + $0x1b0] ss:$8 sps:$4 sm:$0xff]  }
  0x53   :  { %970 = vmatpush1.bf16.msra.mxu1 %v2593_v19  ;;  %928 = vmatprep.subr.bf16.mxu0 %v2594_v20  ;;  %v2287_v53 = vcombine.high %v90_v48, %v94_v49  ;;  %v2289_v55 = vcombine.high %v91_v50, %v95_v51  ;;  %v2642_v58 = vld [vmem:[#allocation7 + $0xa4] ss:$8 sps:$4 sm:$0xff]   ;;  %v2646_v60 = vld [vmem:[#allocation7 + $0xa0] ss:$8 sps:$4 sm:$0xff]   ;;  %v2648_v62 = vld [vmem:[#allocation7 + $0x94] ss:$8 sps:$4 sm:$0xff]   ;;  %v2286_v8 = vcombine.low %v90_v48, %v94_v49 }
  0x54   :  { %971 = vmatprep.subr.bf16.mxu1 %v2596_v21  ;;  %v2644_v59 = vld [vmem:[#allocation7 + $0x1a4] ss:$8 sps:$4 sm:$0xff]   ;;  %v2647_v61 = vld [vmem:[#allocation7 + $0x1a0] ss:$8 sps:$4 sm:$0xff]   ;;  %v2650_v63 = vld [vmem:[#allocation7 + $0x194] ss:$8 sps:$4 sm:$0xff]   ;;  %v2288_v9 = vcombine.low %v91_v50, %v95_v51 }
  0x55   :  { %950 = vmatprep.mubr.bf16.mxu0 %v2287_v53  ;;  %993 = vmatprep.mubr.bf16.mxu1 %v2289_v55  ;;  %v2652_v0 = vld [vmem:[#allocation7 + $0x90] ss:$8 sps:$4 sm:$0xff]   ;;  %v2654_v2 = vld [vmem:[#allocation7 + $0x84] ss:$8 sps:$4 sm:$0xff]   ;;  %v2658_v4 = vld [vmem:[#allocation7 + $0x80] ss:$8 sps:$4 sm:$0xff]  }
  0x56   :  { %929 = vmatpush1.bf16.msra.mxu0 %v2598_v22  ;;  %v2653_v1 = vld [vmem:[#allocation7 + $0x190] ss:$8 sps:$4 sm:$0xff]   ;;  %v2656_v3 = vld [vmem:[#allocation7 + $0x184] ss:$8 sps:$4 sm:$0xff]   ;;  %v2659_v5 = vld [vmem:[#allocation7 + $0x180] ss:$8 sps:$4 sm:$0xff]  }
  0x57   :  { %972 = vmatpush1.bf16.msra.mxu1 %v2599_v23  ;;  %930 = vmatprep.subr.bf16.mxu0 %v2600_v24  ;;  %v2662_v6 = vld [vmem:[#allocation7 + $0x274] ss:$8 sps:$4 sm:$0xff]   ;;  %v2660_v10 = vld [vmem:[#allocation7 + $0x270] ss:$8 sps:$4 sm:$0xff]   ;;  %v2668_v12 = vld [vmem:[#allocation7 + $0x264] ss:$8 sps:$4 sm:$0xff]  }
  0x58   :  { %973 = vmatprep.subr.bf16.mxu1 %v2602_v25  ;;  %v2665_v7 = vld [vmem:[#allocation7 + $0x374] ss:$8 sps:$4 sm:$0xff]   ;;  %v2663_v11 = vld [vmem:[#allocation7 + $0x370] ss:$8 sps:$4 sm:$0xff]   ;;  %v2671_v13 = vld [vmem:[#allocation7 + $0x364] ss:$8 sps:$4 sm:$0xff]  }
  0x59   :  { %v2666_v14 = vld [vmem:[#allocation7 + $0x260] ss:$8 sps:$4 sm:$0xff]   ;;  %v2674_v16 = vld [vmem:[#allocation7 + $0x254] ss:$8 sps:$4 sm:$0xff]   ;;  %v2672_v18 = vld [vmem:[#allocation7 + $0x250] ss:$8 sps:$4 sm:$0xff]  }
  0x5a   :  { %931 = vmatpush1.bf16.msra.mxu0 %v2604_v26  ;;  %v2669_v15 = vld [vmem:[#allocation7 + $0x360] ss:$8 sps:$4 sm:$0xff]   ;;  %v2677_v17 = vld [vmem:[#allocation7 + $0x354] ss:$8 sps:$4 sm:$0xff]   ;;  %v2675_v19 = vld [vmem:[#allocation7 + $0x350] ss:$8 sps:$4 sm:$0xff]  }
  0x5b   :  { %974 = vmatpush1.bf16.msra.mxu1 %v2605_v27  ;;  %932 = vmatprep.subr.bf16.mxu0 %v2606_v28  ;;  %v2680_v20 = vld [vmem:[#allocation7 + $0x244] ss:$8 sps:$4 sm:$0xff]   ;;  %v2678_v22 = vld [vmem:[#allocation7 + $0x240] ss:$8 sps:$4 sm:$0xff]   ;;  %v2686_v24 = vld [vmem:[#allocation7 + $0x234] ss:$8 sps:$4 sm:$0xff]  }
  0x5c   :  { %975 = vmatprep.subr.bf16.mxu1 %v2608_v29  ;;  %v2683_v21 = vld [vmem:[#allocation7 + $0x344] ss:$8 sps:$4 sm:$0xff]   ;;  %v2681_v23 = vld [vmem:[#allocation7 + $0x340] ss:$8 sps:$4 sm:$0xff]   ;;  %v2689_v25 = vld [vmem:[#allocation7 + $0x334] ss:$8 sps:$4 sm:$0xff]  }
  0x5d   :  { %v2684_v26 = vld [vmem:[#allocation7 + $0x230] ss:$8 sps:$4 sm:$0xff]   ;;  %v2692_v28 = vld [vmem:[#allocation7 + $0x224] ss:$8 sps:$4 sm:$0xff]   ;;  %v2717_v53 = vld [vmem:[#allocation7 + $0x3e0] ss:$8 sps:$4 sm:$0xff]  }
  0x5e   :  { %933 = vmatpush1.bf16.msra.mxu0 %v2610_v30  ;;  %v2687_v27 = vld [vmem:[#allocation7 + $0x330] ss:$8 sps:$4 sm:$0xff]   ;;  %v2695_v29 = vld [vmem:[#allocation7 + $0x324] ss:$8 sps:$4 sm:$0xff]   ;;  %v2690_v30 = vld [vmem:[#allocation7 + $0x220] ss:$8 sps:$4 sm:$0xff]  }
  0x5f   :  { %976 = vmatpush1.bf16.msra.mxu1 %v2611_v31  ;;  %934 = vmatprep.subr.bf16.mxu0 %v2612_v32  ;;  %v2693_v31 = vld [vmem:[#allocation7 + $0x320] ss:$8 sps:$4 sm:$0xff]   ;;  %v2698_v32 = vld [vmem:[#allocation7 + $0x214] ss:$8 sps:$4 sm:$0xff]   ;;  %v2708_v48 = vld [vmem:[#allocation7 + $0x2f0] ss:$8 sps:$4 sm:$0xff]  }
  0x60   :  { %977 = vmatprep.subr.bf16.mxu1 %v2614_v33  ;;  %v2701_v33 = vld [vmem:[#allocation7 + $0x314] ss:$8 sps:$4 sm:$0xff]   ;;  %v2711_v49 = vld [vmem:[#allocation7 + $0x3f0] ss:$8 sps:$4 sm:$0xff]   ;;  %v2716_v50 = vld [vmem:[#allocation7 + $0x2e4] ss:$8 sps:$4 sm:$0xff]  }
  0x61   :  { %v2719_v51 = vld [vmem:[#allocation7 + $0x3e4] ss:$8 sps:$4 sm:$0xff]   ;;  %v2725_v55 = vld [vmem:[#allocation7 + $0x3d4] ss:$8 sps:$4 sm:$0xff]  }
  0x62   :  { %935 = vmatpush2.bf16.msra.mxu0 %v2616_v34  ;;  %v2966_v34 = vld [vmem:[#allocation2 + $0x10] sm:$0xff] }
  0x63   :  { %978 = vmatpush2.bf16.msra.mxu1 %v2617_v35  ;;  %936 = vmatprep.subr.bf16.mxu0 %v2618_v36  ;;  %v2968_v35 = vld [vmem:[#allocation2 + $0x30] sm:$0xff]  ;;  %v2970_v36 = vld [vmem:[#allocation2 + $0x18] sm:$0xff] }
  0x64   :  { %979 = vmatprep.subr.bf16.mxu1 %v2620_v37  ;;  %v2972_v37 = vld [vmem:[#allocation2 + $0x38] sm:$0xff] }
  0x66   :  { %937 = vmatpush2.bf16.msra.mxu0 %v2622_v38  ;;  %v2696_v38 = vld [vmem:[#allocation7 + $0x210] ss:$8 sps:$4 sm:$0xff]  }
  0x67   :  { %980 = vmatpush2.bf16.msra.mxu1 %v2623_v39  ;;  %938 = vmatprep.subr.bf16.mxu0 %v2624_v40  ;;  %v2699_v39 = vld [vmem:[#allocation7 + $0x310] ss:$8 sps:$4 sm:$0xff]   ;;  %v2291_v40 = vcombine.high %v2966_v34, %v2968_v35 }
  0x68   :  { %981 = vmatprep.subr.bf16.mxu1 %v2626_v41  ;;  %v2704_v41 = vld [vmem:[#allocation7 + $0x204] ss:$8 sps:$4 sm:$0xff]  }
  0x6a   :  { %939 = vmatpush2.bf16.msra.mxu0 %v2628_v42  ;;  %v2707_v42 = vld [vmem:[#allocation7 + $0x304] ss:$8 sps:$4 sm:$0xff]  }
  0x6b   :  { %982 = vmatpush2.bf16.msra.mxu1 %v2629_v43  ;;  %940 = vmatprep.subr.bf16.mxu0 %v2630_v44  ;;  %v2293_v43 = vcombine.high %v2970_v36, %v2972_v37  ;;  %v2702_v44 = vld [vmem:[#allocation7 + $0x200] ss:$8 sps:$4 sm:$0xff]  }
  0x6c   :  { %983 = vmatprep.subr.bf16.mxu1 %v2632_v45  ;;  %v2705_v45 = vld [vmem:[#allocation7 + $0x300] ss:$8 sps:$4 sm:$0xff]  }
  0x6e   :  { %941 = vmatpush2.bf16.msra.mxu0 %v2634_v46  ;;  %v2710_v46 = vld [vmem:[#allocation7 + $0x2f4] ss:$8 sps:$4 sm:$0xff]  }
  0x6f   :  { %984 = vmatpush2.bf16.msra.mxu1 %v2635_v47  ;;  %942 = vmatprep.subr.bf16.mxu0 %v2636_v52  ;;  %v2713_v47 = vld [vmem:[#allocation7 + $0x3f4] ss:$8 sps:$4 sm:$0xff]   ;;  %v2714_v52 = vld [vmem:[#allocation7 + $0x2e0] ss:$8 sps:$4 sm:$0xff]  }
  0x70   :  { %985 = vmatprep.subr.bf16.mxu1 %v2638_v54  ;;  %v2722_v54 = vld [vmem:[#allocation7 + $0x2d4] ss:$8 sps:$4 sm:$0xff]  }
  0x72   :  { %943 = vmatpush2.bf16.msra.mxu0 %v2640_v56  ;;  %v2720_v56 = vld [vmem:[#allocation7 + $0x2d0] ss:$8 sps:$4 sm:$0xff]  }
  0x73   :  { %986 = vmatpush2.bf16.msra.mxu1 %v2641_v57  ;;  %944 = vmatprep.subr.bf16.mxu0 %v2642_v58  ;;  %v2723_v57 = vld [vmem:[#allocation7 + $0x3d0] ss:$8 sps:$4 sm:$0xff]   ;;  %v2728_v58 = vld [vmem:[#allocation7 + $0x2c4] ss:$8 sps:$4 sm:$0xff]  }
  0x74   :  { %987 = vmatprep.subr.bf16.mxu1 %v2644_v59  ;;  %v2731_v59 = vld [vmem:[#allocation7 + $0x3c4] ss:$8 sps:$4 sm:$0xff]  }
  0x76   :  { %945 = vmatpush2.bf16.msra.mxu0 %v2646_v60  ;;  %v2726_v60 = vld [vmem:[#allocation7 + $0x2c0] ss:$8 sps:$4 sm:$0xff]  }
  0x77   :  { %988 = vmatpush2.bf16.msra.mxu1 %v2647_v61  ;;  %946 = vmatprep.subr.bf16.mxu0 %v2648_v62  ;;  %v2729_v61 = vld [vmem:[#allocation7 + $0x3c0] ss:$8 sps:$4 sm:$0xff]   ;;  %v2734_v62 = vld [vmem:[#allocation7 + $0x2b4] ss:$8 sps:$4 sm:$0xff]  }
  0x78   :  { %989 = vmatprep.subr.bf16.mxu1 %v2650_v63  ;;  %v2737_v63 = vld [vmem:[#allocation7 + $0x3b4] ss:$8 sps:$4 sm:$0xff]  }
  0x7a   :  { %947 = vmatpush2.bf16.msra.mxu0 %v2652_v0  ;;  %v2732_v0 = vld [vmem:[#allocation7 + $0x2b0] ss:$8 sps:$4 sm:$0xff]  }
  0x7b   :  { %990 = vmatpush2.bf16.msra.mxu1 %v2653_v1  ;;  %948 = vmatprep.subr.bf16.mxu0 %v2654_v2  ;;  %v2735_v1 = vld [vmem:[#allocation7 + $0x3b0] ss:$8 sps:$4 sm:$0xff]   ;;  %v2740_v2 = vld [vmem:[#allocation7 + $0x2a4] ss:$8 sps:$4 sm:$0xff]  }
  0x7c   :  { %991 = vmatprep.subr.bf16.mxu1 %v2656_v3  ;;  %v2743_v3 = vld [vmem:[#allocation7 + $0x3a4] ss:$8 sps:$4 sm:$0xff]  }
  0x7e   :  { %949 = vmatpush2.bf16.msra.mxu0 %v2658_v4  ;;  %v2738_v4 = vld [vmem:[#allocation7 + $0x2a0] ss:$8 sps:$4 sm:$0xff]  }
  0x7f   :  { %992 = vmatpush2.bf16.msra.mxu1 %v2659_v5  ;;  %1004 = vmatprep.subr.bf16.mxu0 %v2662_v6  ;;  %v2741_v5 = vld [vmem:[#allocation7 + $0x3a0] ss:$8 sps:$4 sm:$0xff]   ;;  %v2746_v6 = vld [vmem:[#allocation7 + $0x294] ss:$8 sps:$4 sm:$0xff]  }
  0x80   :  { %1047 = vmatprep.subr.bf16.mxu1 %v2665_v7  ;;  %v2749_v7 = vld [vmem:[#allocation7 + $0x394] ss:$8 sps:$4 sm:$0xff]  }
  0x81   :  { %951 = vmatmul.mubr.bf16.vlgmr.msra.gmra.mxu0 %v2286_v8  ;;  %v2744_v8 = vld [vmem:[#allocation7 + $0x290] ss:$8 sps:$4 sm:$0xff]  }
  0x82   :  { %994 = vmatmul.mubr.bf16.vlgmr.msra.gmra.mxu1 %v2288_v9  ;;  %1005 = vmatpush1.bf16.msra.mxu0 %v2660_v10  ;;  %v2747_v9 = vld [vmem:[#allocation7 + $0x390] ss:$8 sps:$4 sm:$0xff]   ;;  %v2752_v10 = vld [vmem:[#allocation7 + $0x284] ss:$8 sps:$4 sm:$0xff]  }
  0x83   :  { %1048 = vmatpush1.bf16.msra.mxu1 %v2663_v11  ;;  %1006 = vmatprep.subr.bf16.mxu0 %v2668_v12  ;;  %v2755_v11 = vld [vmem:[#allocation7 + $0x384] ss:$8 sps:$4 sm:$0xff]   ;;  %v2750_v12 = vld [vmem:[#allocation7 + $0x280] ss:$8 sps:$4 sm:$0xff]  }
  0x84   :  { %1049 = vmatprep.subr.bf16.mxu1 %v2671_v13  ;;  %1036 = vmatprep.mubr.bf16.mxu0 %v2291_v40  ;;  %v2753_v13 = vld [vmem:[#allocation7 + $0x380] ss:$8 sps:$4 sm:$0xff]  }
  0x85   :  { %1079 = vmatprep.mubr.bf16.mxu1 %v2293_v43  ;;  %v1129_v40 = vld [vmem:[#allocation10 + $0x108] sm:$0xff] }
  0x86   :  { %1007 = vmatpush1.bf16.msra.mxu0 %v2666_v14  ;;  %v2290_v14 = vcombine.low %v2966_v34, %v2968_v35 }
  0x87   :  { %1050 = vmatpush1.bf16.msra.mxu1 %v2669_v15  ;;  %1008 = vmatprep.subr.bf16.mxu0 %v2674_v16  ;;  %v2292_v15 = vcombine.low %v2970_v36, %v2972_v37  ;;  %v1152_v16 = vld [vmem:[#allocation10 + $0x1c0] sm:$0xff] }
  0x88   :  { %1051 = vmatprep.subr.bf16.mxu1 %v2677_v17  ;;  %v1156_v17 = vld [vmem:[#allocation10 + $0x1e0] sm:$0xff] }
  0x8a   :  { %1009 = vmatpush1.bf16.msra.mxu0 %v2672_v18  ;;  %v1153_v18 = vld [vmem:[#allocation10 + $0x1c8] sm:$0xff] }
  0x8b   :  { %1052 = vmatpush1.bf16.msra.mxu1 %v2675_v19  ;;  %1010 = vmatprep.subr.bf16.mxu0 %v2680_v20  ;;  %v2478_v19 = vcombine.low %v1152_v16, %v1156_v17  ;;  %v2479_v20 = vcombine.high %v1152_v16, %v1156_v17  ;;  %v1217_v16 = vld [vmem:[#allocation10 + $0x3c8] sm:$0xff] }
  0x8c   :  { %1053 = vmatprep.subr.bf16.mxu1 %v2683_v21  ;;  %v1157_v21 = vld [vmem:[#allocation10 + $0x1e8] sm:$0xff] }
  0x8d   :  { %v1221_v17 = vld [vmem:[#allocation10 + $0x3e8] sm:$0xff] }
  0x8e   :  { %1011 = vmatpush1.bf16.msra.mxu0 %v2678_v22  ;;  %v1144_v22 = vld [vmem:[#allocation10 + $0x180] sm:$0xff] }
  0x8f   :  { %1054 = vmatpush1.bf16.msra.mxu1 %v2681_v23  ;;  %1012 = vmatprep.subr.bf16.mxu0 %v2686_v24  ;;  %v1148_v23 = vld [vmem:[#allocation10 + $0x1a0] sm:$0xff]  ;;  %v2480_v24 = vcombine.low %v1153_v18, %v1157_v21 }
  0x90   :  { %1055 = vmatprep.subr.bf16.mxu1 %v2689_v25  ;;  %v2481_v25 = vcombine.high %v1153_v18, %v1157_v21  ;;  %v2470_v34 = vcombine.low %v1144_v22, %v1148_v23  ;;  %v2545_v21 = vcombine.high %v1217_v16, %v1221_v17 }
  0x92   :  { %1013 = vmatpush1.bf16.msra.mxu0 %v2684_v26  ;;  %v2471_v26 = vcombine.high %v1144_v22, %v1148_v23  ;;  %v1208_v22 = vld [vmem:[#allocation10 + $0x380] sm:$0xff] }
  0x93   :  { %1056 = vmatpush1.bf16.msra.mxu1 %v2687_v27  ;;  %1014 = vmatprep.subr.bf16.mxu0 %v2692_v28  ;;  %v1145_v27 = vld [vmem:[#allocation10 + $0x188] sm:$0xff]  ;;  %v1212_v23 = vld [vmem:[#allocation10 + $0x3a0] sm:$0xff] }
  0x94   :  { %1057 = vmatprep.subr.bf16.mxu1 %v2695_v29  ;;  %v1149_v28 = vld [vmem:[#allocation10 + $0x1a8] sm:$0xff]  ;;  %v1136_v29 = vld [vmem:[#allocation10 + $0x140] sm:$0xff] }
  0x95   :  { %v2472_v35 = vcombine.low %v1145_v27, %v1149_v28 }
  0x96   :  { %1015 = vmatpush1.bf16.msra.mxu0 %v2690_v30  ;;  %v2473_v30 = vcombine.high %v1145_v27, %v1149_v28  ;;  %v2544_v27 = vcombine.low %v1217_v16, %v1221_v17  ;;  %v2535_v28 = vcombine.high %v1208_v22, %v1212_v23  ;;  %v2982_v16 = vld [vmem:[#allocation10 + $0x1d0] sm:$0xff] }
  0x97   :  { %1058 = vmatpush1.bf16.msra.mxu1 %v2693_v31  ;;  %1016 = vmatprep.subr.bf16.mxu0 %v2698_v32  ;;  %v1140_v31 = vld [vmem:[#allocation10 + $0x160] sm:$0xff]  ;;  %v1137_v32 = vld [vmem:[#allocation10 + $0x148] sm:$0xff]  ;;  %v2984_v17 = vld [vmem:[#allocation10 + $0x1f0] sm:$0xff] }
  0x98   :  { %1059 = vmatprep.subr.bf16.mxu1 %v2701_v33  ;;  %v1141_v33 = vld [vmem:[#allocation10 + $0x168] sm:$0xff]  ;;  %v2463_v36 = vcombine.high %v1136_v29, %v1140_v31 }
  0x99   :  { %v2465_v37 = vcombine.high %v1137_v32, %v1141_v33  ;;  %v2464_v43 = vcombine.low %v1137_v32, %v1141_v33  ;;  %v1201_v32 = vld [vmem:[#allocation10 + $0x348] sm:$0xff] }
  0x9a   :  { %1017 = vmatpush1.bf16.msra.mxu0 %v2696_v38  ;;  %v1128_v38 = vld [vmem:[#allocation10 + $0x100] sm:$0xff]  ;;  %v1205_v33 = vld [vmem:[#allocation10 + $0x368] sm:$0xff] }
  0x9b   :  { %1060 = vmatpush1.bf16.msra.mxu1 %v2699_v39  ;;  %1018 = vmatprep.subr.bf16.mxu0 %v2704_v41  ;;  %v1132_v39 = vld [vmem:[#allocation10 + $0x120] sm:$0xff]  ;;  %v1133_v41 = vld [vmem:[#allocation10 + $0x128] sm:$0xff] }
  0x9c   :  { %1061 = vmatprep.subr.bf16.mxu1 %v2707_v42  ;;  %v2462_v42 = vcombine.low %v1136_v29, %v1140_v31  ;;  %v1204_v31 = vld [vmem:[#allocation10 + $0x360] sm:$0xff] }
  0x9e   :  { %1019 = vmatpush1.bf16.msra.mxu0 %v2702_v44  ;;  %v2455_v44 = vcombine.high %v1128_v38, %v1132_v39 }
  0x9f   :  { %1062 = vmatpush1.bf16.msra.mxu1 %v2705_v45  ;;  %1020 = vmatprep.subr.bf16.mxu0 %v2710_v46  ;;  %v2457_v45 = vcombine.high %v1129_v40, %v1133_v41  ;;  %v1120_v46 = vld [vmem:[#allocation10 + $0xc0] sm:$0xff] }
  0xa0   :  { %1063 = vmatprep.subr.bf16.mxu1 %v2713_v47  ;;  %v1124_v47 = vld [vmem:[#allocation10 + $0xe0] sm:$0xff] }
  0xa2   :  { %1021 = vmatpush2.bf16.msra.mxu0 %v2708_v48  ;;  %v1121_v48 = vld [vmem:[#allocation10 + $0xc8] sm:$0xff] }
  0xa3   :  { %1064 = vmatpush2.bf16.msra.mxu1 %v2711_v49  ;;  %1022 = vmatprep.subr.bf16.mxu0 %v2716_v50  ;;  %v1125_v49 = vld [vmem:[#allocation10 + $0xe8] sm:$0xff]  ;;  %v2454_v50 = vcombine.low %v1128_v38, %v1132_v39  ;;  %v1192_v38 = vld [vmem:[#allocation10 + $0x300] sm:$0xff] }
  0xa4   :  { %1065 = vmatprep.subr.bf16.mxu1 %v2719_v51  ;;  %v2456_v51 = vcombine.low %v1129_v40, %v1133_v41  ;;  %v1196_v39 = vld [vmem:[#allocation10 + $0x320] sm:$0xff]  ;;  %v1193_v40 = vld [vmem:[#allocation10 + $0x308] sm:$0xff] }
  0xa5   :  { %v1197_v41 = vld [vmem:[#allocation10 + $0x328] sm:$0xff] }
  0xa6   :  { %1023 = vmatpush2.bf16.msra.mxu0 %v2714_v52  ;;  %v2447_v52 = vcombine.high %v1120_v46, %v1124_v47 }
  0xa7   :  { %1066 = vmatpush2.bf16.msra.mxu1 %v2717_v53  ;;  %1024 = vmatprep.subr.bf16.mxu0 %v2722_v54  ;;  %v2449_v53 = vcombine.high %v1121_v48, %v1125_v49  ;;  %v1112_v54 = vld [vmem:[#allocation10 + $0x80] sm:$0xff] }
  0xa8   :  { %1067 = vmatprep.subr.bf16.mxu1 %v2725_v55  ;;  %v1116_v55 = vld [vmem:[#allocation10 + $0xa0] sm:$0xff] }
  0xaa   :  { %1025 = vmatpush2.bf16.msra.mxu0 %v2720_v56  ;;  %v1113_v56 = vld [vmem:[#allocation10 + $0x88] sm:$0xff] }
  0xab   :  { %1068 = vmatpush2.bf16.msra.mxu1 %v2723_v57  ;;  %1026 = vmatprep.subr.bf16.mxu0 %v2728_v58  ;;  %v1117_v57 = vld [vmem:[#allocation10 + $0xa8] sm:$0xff]  ;;  %v2446_v58 = vcombine.low %v1120_v46, %v1124_v47  ;;  %v1184_v46 = vld [vmem:[#allocation10 + $0x2c0] sm:$0xff] }
  0xac   :  { %1069 = vmatprep.subr.bf16.mxu1 %v2731_v59  ;;  %v2448_v59 = vcombine.low %v1121_v48, %v1125_v49  ;;  %v1188_v47 = vld [vmem:[#allocation10 + $0x2e0] sm:$0xff]  ;;  %v1185_v48 = vld [vmem:[#allocation10 + $0x2c8] sm:$0xff] }
  0xad   :  { %v1189_v49 = vld [vmem:[#allocation10 + $0x2e8] sm:$0xff] }
  0xae   :  { %1027 = vmatpush2.bf16.msra.mxu0 %v2726_v60  ;;  %v2439_v60 = vcombine.high %v1112_v54, %v1116_v55 }
  0xaf   :  { %1070 = vmatpush2.bf16.msra.mxu1 %v2729_v61  ;;  %1028 = vmatprep.subr.bf16.mxu0 %v2734_v62  ;;  %v2441_v61 = vcombine.high %v1113_v56, %v1117_v57  ;;  %v1104_v62 = vld [vmem:[#allocation10 + $0x40] sm:$0xff] }
  0xb0   :  { %1071 = vmatprep.subr.bf16.mxu1 %v2737_v63  ;;  %v1108_v63 = vld [vmem:[#allocation10 + $0x60] sm:$0xff] }
  0xb2   :  { %1029 = vmatpush2.bf16.msra.mxu0 %v2732_v0  ;;  %v1105_v0 = vld [vmem:[#allocation10 + $0x48] sm:$0xff] }
  0xb3   :  { %1072 = vmatpush2.bf16.msra.mxu1 %v2735_v1  ;;  %1030 = vmatprep.subr.bf16.mxu0 %v2740_v2  ;;  %v1109_v1 = vld [vmem:[#allocation10 + $0x68] sm:$0xff]  ;;  %v2438_v2 = vcombine.low %v1112_v54, %v1116_v55  ;;  %v2510_v54 = vcombine.low %v1184_v46, %v1188_v47  ;;  %v2512_v55 = vcombine.low %v1185_v48, %v1189_v49 }
  0xb4   :  { %1073 = vmatprep.subr.bf16.mxu1 %v2743_v3  ;;  %v2440_v3 = vcombine.low %v1113_v56, %v1117_v57  ;;  %v1176_v56 = vld [vmem:[#allocation10 + $0x280] sm:$0xff] }
  0xb5   :  { %v1180_v57 = vld [vmem:[#allocation10 + $0x2a0] sm:$0xff] }
  0xb6   :  { %1031 = vmatpush2.bf16.msra.mxu0 %v2738_v4  ;;  %v2431_v4 = vcombine.high %v1104_v62, %v1108_v63 }
  0xb7   :  { %1074 = vmatpush2.bf16.msra.mxu1 %v2741_v5  ;;  %1032 = vmatprep.subr.bf16.mxu0 %v2746_v6  ;;  %v2433_v5 = vcombine.high %v1105_v0, %v1109_v1  ;;  %v1096_v6 = vld [vmem:[#allocation10] sm:$0xff] }
  0xb8   :  { %1075 = vmatprep.subr.bf16.mxu1 %v2749_v7  ;;  %v1100_v7 = vld [vmem:[#allocation10 + $0x20] sm:$0xff] }
  0xb9   :  { %v2422_v18 = vcombine.low %v1096_v6, %v1100_v7 }
  0xba   :  { %1033 = vmatpush2.bf16.msra.mxu0 %v2744_v8  ;;  %v1097_v8 = vld [vmem:[#allocation10 + $0x8] sm:$0xff] }
  0xbb   :  { %1076 = vmatpush2.bf16.msra.mxu1 %v2747_v9  ;;  %1034 = vmatprep.subr.bf16.mxu0 %v2752_v10  ;;  %v1101_v9 = vld [vmem:[#allocation10 + $0x28] sm:$0xff]  ;;  %v2430_v10 = vcombine.low %v1104_v62, %v1108_v63 }
  0xbc   :  { %1077 = vmatprep.subr.bf16.mxu1 %v2755_v11  ;;  %v2432_v11 = vcombine.low %v1105_v0, %v1109_v1  ;;  %v1168_v0 = vld [vmem:[#allocation10 + $0x240] sm:$0xff] }
  0xbd   :  { %v1172_v1 = vld [vmem:[#allocation10 + $0x260] sm:$0xff] }
  0xbe   :  { %1035 = vmatpush2.bf16.msra.mxu0 %v2750_v12  ;;  %v2423_v12 = vcombine.high %v1096_v6, %v1100_v7 }
  0xbf   :  { %1078 = vmatpush2.bf16.msra.mxu1 %v2753_v13  ;;  %1906 = vmatprep.subr.bf16.mxu0 %v2479_v20  ;;  %v2425_v13 = vcombine.high %v1097_v8, %v1101_v9 }
  0xc0   :  { %1949 = vmatprep.subr.bf16.mxu1 %v2481_v25  ;;  %v1213_v25 = vld [vmem:[#allocation10 + $0x3a8] sm:$0xff] }
  0xc1   :  { %1037 = vmatmul.mubr.bf16.vlgmr.msra.gmra.mxu0 %v2290_v14  ;;  %v1216_v14 = vld [vmem:[#allocation10 + $0x3c0] sm:$0xff] }
  0xc2   :  { %1080 = vmatmul.mubr.bf16.vlgmr.msra.gmra.mxu1 %v2292_v15  ;;  %1907 = vmatpush1.bf16.msra.mxu0 %v2478_v19  ;;  %v1220_v15 = vld [vmem:[#allocation10 + $0x3e0] sm:$0xff]  ;;  %v2424_v19 = vcombine.low %v1097_v8, %v1101_v9 }
  0xc3   :  { %1950 = vmatpush1.bf16.msra.mxu1 %v2480_v24  ;;  %1908 = vmatprep.subr.bf16.mxu0 %v2471_v26  ;;  %v2543_v20 = vcombine.high %v1216_v14, %v1220_v15  ;;  %v1209_v24 = vld [vmem:[#allocation10 + $0x388] sm:$0xff]  ;;  %v2542_v26 = vcombine.low %v1216_v14, %v1220_v15  ;;  %v1160_v8 = vld [vmem:[#allocation10 + $0x200] sm:$0xff] }
  0xc4   :  { %1951 = vmatprep.subr.bf16.mxu1 %v2473_v30  ;;  %v2537_v29 = vcombine.high %v1209_v24, %v1213_v25  ;;  %v1200_v30 = vld [vmem:[#allocation10 + $0x340] sm:$0xff] }
  0xc5   :  { %v1164_v9 = vld [vmem:[#allocation10 + $0x220] sm:$0xff] }
  0xc6   :  { %1909 = vmatpush1.bf16.msra.mxu0 %v2470_v34  ;;  %v2534_v34 = vcombine.low %v1208_v22, %v1212_v23 }
  0xc7   :  { %1952 = vmatpush1.bf16.msra.mxu1 %v2472_v35  ;;  %1910 = vmatprep.subr.bf16.mxu0 %v2463_v36  ;;  %v2536_v35 = vcombine.low %v1209_v24, %v1213_v25  ;;  %v2527_v36 = vcombine.high %v1200_v30, %v1204_v31  ;;  %v228_v24 = vlaneseq }
  0xc8   :  { %1953 = vmatprep.subr.bf16.mxu1 %v2465_v37  ;;  %v2529_v37 = vcombine.high %v1201_v32, %v1205_v33 }
  0xc9   :  { %v2998_v25 = vshrl.u32 %v228_v24, 7 }
  0xca   :  { %1911 = vmatpush1.bf16.msra.mxu0 %v2462_v42  ;;  %v2526_v42 = vcombine.low %v1200_v30, %v1204_v31 }
  0xcb   :  { %1954 = vmatpush1.bf16.msra.mxu1 %v2464_v43  ;;  %1912 = vmatprep.subr.bf16.mxu0 %v2455_v44  ;;  %v2528_v43 = vcombine.low %v1201_v32, %v1205_v33  ;;  %v2519_v44 = vcombine.high %v1192_v38, %v1196_v39  ;;  %v230_v30 = vsub.s32 0, %v2998_v25  ;;  %vm2209_vm0 = vcmp.lt.s32.totalorder %v2998_v25, 2 }
  0xcc   :  { %1955 = vmatprep.subr.bf16.mxu1 %v2457_v45  ;;  %v2521_v45 = vcombine.high %v1193_v40, %v1197_v41 }
  0xce   :  { %1913 = vmatpush1.bf16.msra.mxu0 %v2454_v50  ;;  %v2518_v50 = vcombine.low %v1192_v38, %v1196_v39 }
  0xcf   :  { %1956 = vmatpush1.bf16.msra.mxu1 %v2456_v51  ;;  %1914 = vmatprep.subr.bf16.mxu0 %v2447_v52  ;;  %v2520_v51 = vcombine.low %v1193_v40, %v1197_v41  ;;  %v2511_v52 = vcombine.high %v1184_v46, %v1188_v47 }
  0xd0   :  { %1957 = vmatprep.subr.bf16.mxu1 %v2449_v53  ;;  %v2513_v53 = vcombine.high %v1185_v48, %v1189_v49 }
  0xd2   :  { %1915 = vmatpush1.bf16.msra.mxu0 %v2446_v58  ;;  %v1177_v58 = vld [vmem:[#allocation10 + $0x288] sm:$0xff] }
  0xd3   :  { %1958 = vmatpush1.bf16.msra.mxu1 %v2448_v59  ;;  %1916 = vmatprep.subr.bf16.mxu0 %v2439_v60  ;;  %v2503_v59 = vcombine.high %v1176_v56, %v1180_v57  ;;  %v1181_v60 = vld [vmem:[#allocation10 + $0x2a8] sm:$0xff] }
  0xd4   :  { %1959 = vmatprep.subr.bf16.mxu1 %v2441_v61  ;;  %v2502_v61 = vcombine.low %v1176_v56, %v1180_v57  ;;  %v2504_v62 = vcombine.low %v1177_v58, %v1181_v60  ;;  %v2505_v63 = vcombine.high %v1177_v58, %v1181_v60 }
  0xd6   :  { %1917 = vmatpush1.bf16.msra.mxu0 %v2438_v2  ;;  %v1169_v2 = vld [vmem:[#allocation10 + $0x248] sm:$0xff] }
  0xd7   :  { %1960 = vmatpush1.bf16.msra.mxu1 %v2440_v3  ;;  %1918 = vmatprep.subr.bf16.mxu0 %v2431_v4  ;;  %v2495_v3 = vcombine.high %v1168_v0, %v1172_v1  ;;  %v1173_v4 = vld [vmem:[#allocation10 + $0x268] sm:$0xff] }
  0xd8   :  { %1961 = vmatprep.subr.bf16.mxu1 %v2433_v5  ;;  %v2494_v5 = vcombine.low %v1168_v0, %v1172_v1  ;;  %v2496_v6 = vcombine.low %v1169_v2, %v1173_v4  ;;  %v2497_v7 = vcombine.high %v1169_v2, %v1173_v4  ;;  %v1146_v2 = vld [vmem:[#allocation10 + $0x190] sm:$0xff] }
  0xd9   :  { %v1150_v4 = vld [vmem:[#allocation10 + $0x1b0] sm:$0xff] }
  0xda   :  { %1919 = vmatpush1.bf16.msra.mxu0 %v2430_v10  ;;  %v1161_v10 = vld [vmem:[#allocation10 + $0x208] sm:$0xff] }
  0xdb   :  { %1962 = vmatpush1.bf16.msra.mxu1 %v2432_v11  ;;  %1920 = vmatprep.subr.bf16.mxu0 %v2423_v12  ;;  %v2487_v11 = vcombine.high %v1160_v8, %v1164_v9  ;;  %v1165_v12 = vld [vmem:[#allocation10 + $0x228] sm:$0xff] }
  0xdc   :  { %1963 = vmatprep.subr.bf16.mxu1 %v2425_v13  ;;  %v2486_v13 = vcombine.low %v1160_v8, %v1164_v9  ;;  %v2488_v14 = vcombine.low %v1161_v10, %v1165_v12  ;;  %v2489_v15 = vcombine.high %v1161_v10, %v1165_v12  ;;  %v1138_v9 = vld [vmem:[#allocation10 + $0x150] sm:$0xff]  ;;  %v2475_v10 = vcombine.high %v1146_v2, %v1150_v4 }
  0xdd   :  { %v1142_v12 = vld [vmem:[#allocation10 + $0x170] sm:$0xff] }
  0xde   :  { %1921 = vmatpush1.bf16.msra.mxu0 %v2422_v18  ;;  %v2986_v18 = vld [vmem:[#allocation10 + $0x1d8] sm:$0xff] }
  0xdf   :  { %1964 = vmatpush1.bf16.msra.mxu1 %v2424_v19  ;;  %1922 = vmatprep.subr.bf16.mxu0 %v2543_v20  ;;  %v2483_v19 = vcombine.high %v2982_v16, %v2984_v17  ;;  %v2990_v20 = vld [vmem:[#allocation10 + $0x1f8] sm:$0xff] }
  0xe0   :  { %1965 = vmatprep.subr.bf16.mxu1 %v2545_v21  ;;  %v2482_v21 = vcombine.low %v2982_v16, %v2984_v17  ;;  %v2484_v22 = vcombine.low %v2986_v18, %v2990_v20  ;;  %v2485_v23 = vcombine.high %v2986_v18, %v2990_v20  ;;  %v2466_v16 = vcombine.low %v1138_v9, %v1142_v12 }
  0xe2   :  { %1923 = vmatpush2.bf16.msra.mxu0 %v2542_v26 }
  0xe3   :  { %1966 = vmatpush2.bf16.msra.mxu1 %v2544_v27  ;;  %1924 = vmatprep.subr.bf16.mxu0 %v2535_v28  ;;  %v234_v28 = vsub.s32 1, %v2998_v25 }
  0xe4   :  { %1967 = vmatprep.subr.bf16.mxu1 %v2537_v29  ;;  %v226_v29 = vld [vmem:[#allocation8] sm:$0x3] }
  0xe5   :  { %v235_v33 = vrot.slane %v226_v29, %v234_v28 }
  0xe6   :  { %1925 = vmatpush2.bf16.msra.mxu0 %v2534_v34  ;;  %v231_v34 = vrot.slane %v226_v29, %v230_v30  ;;  %v1131_v29 = vld [vmem:[#allocation10 + $0x118] sm:$0xff] }
  0xe7   :  { %1968 = vmatpush2.bf16.msra.mxu1 %v2536_v35  ;;  %1926 = vmatprep.subr.bf16.mxu0 %v2527_v36 }
  0xe8   :  { %1969 = vmatprep.subr.bf16.mxu1 %v2529_v37 }
  0xea   :  { %1927 = vmatpush2.bf16.msra.mxu0 %v2526_v42 }
  0xeb   :  { %1970 = vmatpush2.bf16.msra.mxu1 %v2528_v43  ;;  %1928 = vmatprep.subr.bf16.mxu0 %v2519_v44 }
  0xec   :  { %1971 = vmatprep.subr.bf16.mxu1 %v2521_v45 }
  0xee   :  { %1929 = vmatpush2.bf16.msra.mxu0 %v2518_v50 }
  0xef   :  { %1972 = vmatpush2.bf16.msra.mxu1 %v2520_v51  ;;  %1930 = vmatprep.subr.bf16.mxu0 %v2511_v52 }
  0xf0   :  { %1973 = vmatprep.subr.bf16.mxu1 %v2513_v53 }
  0xf2   :  { %1931 = vmatpush2.bf16.msra.mxu0 %v2510_v54 }
  0xf3   :  { %1974 = vmatpush2.bf16.msra.mxu1 %v2512_v55  ;;  %1932 = vmatprep.subr.bf16.mxu0 %v2503_v59 }
  0xf4   :  { %1975 = vmatprep.subr.bf16.mxu1 %v2505_v63 }
  0xf6   :  { %1933 = vmatpush2.bf16.msra.mxu0 %v2502_v61 }
  0xf7   :  { %1976 = vmatpush2.bf16.msra.mxu1 %v2504_v62  ;;  %1934 = vmatprep.subr.bf16.mxu0 %v2495_v3 }
  0xf8   :  { %1977 = vmatprep.subr.bf16.mxu1 %v2497_v7 }
  0xfa   :  { %1935 = vmatpush2.bf16.msra.mxu0 %v2494_v5  ;;  %v1147_v5 = vld [vmem:[#allocation10 + $0x198] sm:$0xff] }
  0xfb   :  { %1978 = vmatpush2.bf16.msra.mxu1 %v2496_v6  ;;  %1936 = vmatprep.subr.bf16.mxu0 %v2487_v11  ;;  %v1151_v6 = vld [vmem:[#allocation10 + $0x1b8] sm:$0xff] }
  0xfc   :  { %1979 = vmatprep.subr.bf16.mxu1 %v2489_v15  ;;  %v2477_v11 = vcombine.high %v1147_v5, %v1151_v6  ;;  %v2474_v15 = vcombine.low %v1146_v2, %v1150_v4 }
  0xfe   :  { %1937 = vmatpush2.bf16.msra.mxu0 %v2486_v13  ;;  %v1139_v13 = vld [vmem:[#allocation10 + $0x158] sm:$0xff] }
  0xff   :  { %1980 = vmatpush2.bf16.msra.mxu1 %v2488_v14  ;;  %1992 = vmatprep.subr.bf16.mxu0 %v2483_v19  ;;  %v1143_v14 = vld [vmem:[#allocation10 + $0x178] sm:$0xff]  ;;  %v2476_v19 = vcombine.low %v1147_v5, %v1151_v6  ;;  %v1210_v6 = vld [vmem:[#allocation10 + $0x390] sm:$0xff] }
 0x100   :  { %2035 = vmatprep.subr.bf16.mxu1 %v2485_v23  ;;  %v2467_v23 = vcombine.high %v1138_v9, %v1142_v12  ;;  %v2469_v24 = vcombine.high %v1139_v13, %v1143_v14  ;;  %v2468_v17 = vcombine.low %v1139_v13, %v1143_v14  ;;  %v1211_v9 = vld [vmem:[#allocation10 + $0x398] sm:$0xff] }
 0x141   :  { %v952_v26 = vpop.f32.mrf.mxu0 }
 0x142   :  { %v995_v27 = vpop.f32.mrf.mxu1  ;;  %v953_v38 = vadd.f32 %v952_v26, %v231_v34  ;;  %v1130_v26 = vld [vmem:[#allocation10 + $0x110] sm:$0xff] }
 0x143   :  { %v954_v31 = vpop.f32.mrf.mxu0 }
 0x144   :  { %v997_v32 = vpop.f32.mrf.mxu1  ;;  %v955_v37 = vadd.f32 %v954_v31, %v235_v33  ;;  %v996_v46 = vadd.f32 %v995_v27, %v953_v38  ;;  %v1134_v27 = vld [vmem:[#allocation10 + $0x130] sm:$0xff]  ;;  %v1135_v31 = vld [vmem:[#allocation10 + $0x138] sm:$0xff] }
 0x145   :  { %v956_v35 = vpop.f32.mrf.mxu0  ;;  %v2459_v18 = vcombine.high %v1130_v26, %v1134_v27  ;;  %v2461_v20 = vcombine.high %v1131_v29, %v1135_v31  ;;  %v1114_v38 = vld [vmem:[#allocation10 + $0x90] sm:$0xff] }
 0x146   :  { %v999_v36 = vpop.f32.mrf.mxu1  ;;  %v957_v41 = vadd.f32 %v956_v35, %v231_v34  ;;  %v998_v44 = vadd.f32 %v997_v32, %v955_v37  ;;  %v1123_v32 = vld [vmem:[#allocation10 + $0xd8] sm:$0xff]  ;;  %v2458_v34 = vcombine.low %v1130_v26, %v1134_v27  ;;  %v2460_v35 = vcombine.low %v1131_v29, %v1135_v31 }
 0x147   :  { %v958_v39 = vpop.f32.mrf.mxu0 }
 0x148   :  { %v1001_v40 = vpop.f32.mrf.mxu1  ;;  %v959_v45 = vadd.f32 %v958_v39, %v235_v33  ;;  %v1000_v49 = vadd.f32 %v999_v36, %v957_v41  ;;  %v1127_v33 = vld [vmem:[#allocation10 + $0xf8] sm:$0xff]  ;;  %v1118_v39 = vld [vmem:[#allocation10 + $0xb0] sm:$0xff] }
 0x149   :  { %v2453_v37 = vcombine.high %v1123_v32, %v1127_v33  ;;  %v1119_v41 = vld [vmem:[#allocation10 + $0xb8] sm:$0xff] }
 0x14a   :  { %v1002_v54 = vadd.f32 %v1001_v40, %v959_v45  ;;  %v1115_v40 = vld [vmem:[#allocation10 + $0x98] sm:$0xff] }
 0x14b   :  { %v2445_v45 = vcombine.high %v1115_v40, %v1119_v41 }
 0x181   :  { %v1038_v42 = vpop.f32.mrf.mxu0 }
 0x182   :  { %v1081_v43 = vpop.f32.mrf.mxu1  ;;  %v1039_v51 = vadd.f32 %v1038_v42, %v996_v46  ;;  %v1106_v46 = vld [vmem:[#allocation10 + $0x50] sm:$0xff] }
 0x183   :  { %v1040_v47 = vpop.f32.mrf.mxu0 }
 0x184   :  { %v1083_v48 = vpop.f32.mrf.mxu1  ;;  %v1041_v50 = vadd.f32 %v1040_v47, %v998_v44  ;;  %v1082_v60 = vadd.f32 %v1081_v43, %v1039_v51  ;;  %v2452_v43 = vcombine.low %v1123_v32, %v1127_v33  ;;  %v2443_v44 = vcombine.high %v1114_v38, %v1118_v39  ;;  %v1110_v47 = vld [vmem:[#allocation10 + $0x70] sm:$0xff] }
 0x185   :  { %v1042_v52 = vpop.f32.mrf.mxu0  ;;  %v2444_v51 = vcombine.low %v1115_v40, %v1119_v41 }
 0x186   :  { %v1085_v53 = vpop.f32.mrf.mxu1  ;;  %v1043_v55 = vadd.f32 %v1042_v52, %v1000_v49  ;;  %v1084_v57 = vadd.f32 %v1083_v48, %v1041_v50  ;;  %v1090_v3 = vmax.f32 %v1082_v60, 0.0  ;;  %v1107_v48 = vld [vmem:[#allocation10 + $0x58] sm:$0xff]  ;;  %v2442_v50 = vcombine.low %v1114_v38, %v1118_v39 }
 0x187   :  { %v1044_v56 = vpop.f32.mrf.mxu0  ;;  %v1111_v49 = vld [vmem:[#allocation10 + $0x78] sm:$0xff]  ;;  %v2435_v52 = vcombine.high %v1106_v46, %v1110_v47 }
 0x188   :  { %v1086_v58 = vadd.f32 %v1085_v53, %v1043_v55  ;;  %v1045_v59 = vadd.f32 %v1044_v56, %v1002_v54  ;;  %v1087_v61 = vpop.f32.mrf.mxu1  ;;  %v1091_v0 = vmax.f32 %v1084_v57, 0.0  ;;  %v2437_v53 = vcombine.high %v1107_v48, %v1111_v49  ;;  %v1098_v54 = vld [vmem:[#allocation10 + $0x10] sm:$0xff]  ;;  %v1099_v56 = vld [vmem:[#allocation10 + $0x18] sm:$0xff] }
 0x189   :  { %v1102_v55 = vld [vmem:[#allocation10 + $0x30] sm:$0xff]  ;;  %v1103_v57 = vld [vmem:[#allocation10 + $0x38] sm:$0xff] }
 0x18a   :  { %v1088_v62 = vadd.f32 %v1087_v61, %v1045_v59  ;;  %v1092_v63 = vmax.f32 %v1086_v58, 0.0  ;;  %v2434_v58 = vcombine.low %v1106_v46, %v1110_v47  ;;  %v2436_v59 = vcombine.low %v1107_v48, %v1111_v49 }
 0x18b   :  { %v2427_v60 = vcombine.high %v1098_v54, %v1102_v55  ;;  %v2429_v61 = vcombine.high %v1099_v56, %v1103_v57  ;;  %v2426_v2 = vcombine.low %v1098_v54, %v1102_v55 }
 0x18c   :  { %v1093_v1 = vmax.f32 %v1088_v62, 0.0  ;;  %v3006_v8 = vpack.c.bf16 %v1092_v63, %v1090_v3  ;;  %v1218_v62 = vld [vmem:[#allocation10 + $0x3d0] sm:$0xff]  ;;  %v2428_v3 = vcombine.low %v1099_v56, %v1103_v57 }
 0x18d   :  { %v1222_v63 = vld [vmem:[#allocation10 + $0x3f0] sm:$0xff] }
 0x18e   :  { %v1095_v7 = vpack.c.bf16 %v1093_v1, %v1091_v0  ;;  %v1219_v0 = vld [vmem:[#allocation10 + $0x3d8] sm:$0xff]  ;;  %v2547_v4 = vcombine.high %v1218_v62, %v1222_v63 }
 0x18f   :  { %v1223_v1 = vld [vmem:[#allocation10 + $0x3f8] sm:$0xff] }
 0x190   :  { %1938 = vmatprep.mubr.bf16.mxu0 %v1095_v7  ;;  %1981 = vmatprep.mubr.bf16.mxu1 %v1095_v7  ;;  %v2549_v5 = vcombine.high %v1219_v0, %v1223_v1  ;;  %v2548_v12 = vcombine.low %v1219_v0, %v1223_v1 }
 0x191   :  { %1939 = vmatmul.mubr.bf16.vlgmr.msra.gmra.mxu0 %v3006_v8  ;;  %1982 = vmatmul.mubr.bf16.vlgmr.msra.gmra.mxu1 %v3006_v8 }
 0x192   :  { %1993 = vmatpush1.bf16.msra.mxu0 %v2482_v21  ;;  %2036 = vmatpush1.bf16.msra.mxu1 %v2484_v22  ;;  %v1122_v21 = vld [vmem:[#allocation10 + $0xd0] sm:$0xff] }
 0x193   :  { %2024 = vmatprep.mubr.bf16.mxu0 %v1095_v7  ;;  %2067 = vmatprep.mubr.bf16.mxu1 %v1095_v7  ;;  %v1126_v22 = vld [vmem:[#allocation10 + $0xf0] sm:$0xff] }
 0x194   :  { %1994 = vmatprep.subr.bf16.mxu0 %v2475_v10  ;;  %2037 = vmatprep.subr.bf16.mxu1 %v2477_v11  ;;  %v2451_v36 = vcombine.high %v1122_v21, %v1126_v22  ;;  %v2450_v42 = vcombine.low %v1122_v21, %v1126_v22  ;;  %v1214_v7 = vld [vmem:[#allocation10 + $0x3b0] sm:$0xff]  ;;  %v1215_v10 = vld [vmem:[#allocation10 + $0x3b8] sm:$0xff]  ;;  %v2546_v11 = vcombine.low %v1218_v62, %v1222_v63 }
 0x195   :  { %v2539_v13 = vcombine.high %v1210_v6, %v1214_v7  ;;  %v2541_v14 = vcombine.high %v1211_v9, %v1215_v10  ;;  %v2538_v26 = vcombine.low %v1210_v6, %v1214_v7  ;;  %v2540_v27 = vcombine.low %v1211_v9, %v1215_v10 }
 0x196   :  { %1995 = vmatpush1.bf16.msra.mxu0 %v2474_v15  ;;  %2038 = vmatpush1.bf16.msra.mxu1 %v2476_v19  ;;  %v1202_v15 = vld [vmem:[#allocation10 + $0x350] sm:$0xff] }
 0x197   :  { %1996 = vmatprep.subr.bf16.mxu0 %v2467_v23  ;;  %2039 = vmatprep.subr.bf16.mxu1 %v2469_v24  ;;  %v1206_v19 = vld [vmem:[#allocation10 + $0x370] sm:$0xff]  ;;  %v1203_v23 = vld [vmem:[#allocation10 + $0x358] sm:$0xff] }
 0x198   :  { %v1207_v24 = vld [vmem:[#allocation10 + $0x378] sm:$0xff]  ;;  %v2531_v29 = vcombine.high %v1202_v15, %v1206_v19  ;;  %v2530_v21 = vcombine.low %v1202_v15, %v1206_v19 }
 0x199   :  { %v2533_v31 = vcombine.high %v1203_v23, %v1207_v24  ;;  %v2532_v22 = vcombine.low %v1203_v23, %v1207_v24 }
 0x19a   :  { %1997 = vmatpush1.bf16.msra.mxu0 %v2466_v16  ;;  %2040 = vmatpush1.bf16.msra.mxu1 %v2468_v17  ;;  %v1194_v16 = vld [vmem:[#allocation10 + $0x310] sm:$0xff] }
 0x19b   :  { %1998 = vmatprep.subr.bf16.mxu0 %v2459_v18  ;;  %2041 = vmatprep.subr.bf16.mxu1 %v2461_v20  ;;  %v1198_v17 = vld [vmem:[#allocation10 + $0x330] sm:$0xff]  ;;  %v1195_v18 = vld [vmem:[#allocation10 + $0x318] sm:$0xff] }
 0x19c   :  { %v1199_v20 = vld [vmem:[#allocation10 + $0x338] sm:$0xff]  ;;  %v2523_v32 = vcombine.high %v1194_v16, %v1198_v17  ;;  %v2522_v38 = vcombine.low %v1194_v16, %v1198_v17 }
 0x19d   :  { %v2525_v33 = vcombine.high %v1195_v18, %v1199_v20  ;;  %v2524_v39 = vcombine.low %v1195_v18, %v1199_v20 }
 0x19e   :  { %1999 = vmatpush1.bf16.msra.mxu0 %v2458_v34  ;;  %2042 = vmatpush1.bf16.msra.mxu1 %v2460_v35  ;;  %v1186_v34 = vld [vmem:[#allocation10 + $0x2d0] sm:$0xff] }
 0x19f   :  { %2000 = vmatprep.subr.bf16.mxu0 %v2451_v36  ;;  %2043 = vmatprep.subr.bf16.mxu1 %v2453_v37  ;;  %v1190_v35 = vld [vmem:[#allocation10 + $0x2f0] sm:$0xff]  ;;  %v1187_v36 = vld [vmem:[#allocation10 + $0x2d8] sm:$0xff] }
 0x1a0   :  { %v1191_v37 = vld [vmem:[#allocation10 + $0x2f8] sm:$0xff]  ;;  %v2515_v40 = vcombine.high %v1186_v34, %v1190_v35  ;;  %v2514_v46 = vcombine.low %v1186_v34, %v1190_v35  ;;  %v1248_v34 = vsub.s32 5, %v2998_v25  ;;  %v1256_v35 = vsub.s32 7, %v2998_v25 }
 0x1a1   :  { %v2517_v41 = vcombine.high %v1187_v36, %v1191_v37  ;;  %v2516_v47 = vcombine.low %v1187_v36, %v1191_v37 }
 0x1a2   :  { %2001 = vmatpush1.bf16.msra.mxu0 %v2450_v42  ;;  %2044 = vmatpush1.bf16.msra.mxu1 %v2452_v43  ;;  %v1178_v42 = vld [vmem:[#allocation10 + $0x290] sm:$0xff] }
 0x1a3   :  { %2002 = vmatprep.subr.bf16.mxu0 %v2443_v44  ;;  %2045 = vmatprep.subr.bf16.mxu1 %v2445_v45  ;;  %v1182_v43 = vld [vmem:[#allocation10 + $0x2b0] sm:$0xff]  ;;  %v1179_v44 = vld [vmem:[#allocation10 + $0x298] sm:$0xff] }
 0x1a4   :  { %v1183_v45 = vld [vmem:[#allocation10 + $0x2b8] sm:$0xff]  ;;  %v2507_v48 = vcombine.high %v1178_v42, %v1182_v43  ;;  %v2506_v54 = vcombine.low %v1178_v42, %v1182_v43 }
 0x1a5   :  { %v2509_v49 = vcombine.high %v1179_v44, %v1183_v45  ;;  %v2508_v55 = vcombine.low %v1179_v44, %v1183_v45 }
 0x1a6   :  { %2003 = vmatpush1.bf16.msra.mxu0 %v2442_v50  ;;  %2046 = vmatpush1.bf16.msra.mxu1 %v2444_v51  ;;  %v1170_v50 = vld [vmem:[#allocation10 + $0x250] sm:$0xff] }
 0x1a7   :  { %2004 = vmatprep.subr.bf16.mxu0 %v2435_v52  ;;  %2047 = vmatprep.subr.bf16.mxu1 %v2437_v53  ;;  %v1174_v51 = vld [vmem:[#allocation10 + $0x270] sm:$0xff]  ;;  %v1171_v52 = vld [vmem:[#allocation10 + $0x258] sm:$0xff] }
 0x1a8   :  { %v1175_v53 = vld [vmem:[#allocation10 + $0x278] sm:$0xff]  ;;  %v2499_v56 = vcombine.high %v1170_v50, %v1174_v51  ;;  %v2498_v62 = vcombine.low %v1170_v50, %v1174_v51 }
 0x1a9   :  { %v2501_v57 = vcombine.high %v1171_v52, %v1175_v53  ;;  %v2500_v63 = vcombine.low %v1171_v52, %v1175_v53 }
 0x1aa   :  { %2005 = vmatpush1.bf16.msra.mxu0 %v2434_v58  ;;  %2048 = vmatpush1.bf16.msra.mxu1 %v2436_v59  ;;  %v1162_v58 = vld [vmem:[#allocation10 + $0x210] sm:$0xff] }
 0x1ab   :  { %2006 = vmatprep.subr.bf16.mxu0 %v2427_v60  ;;  %2049 = vmatprep.subr.bf16.mxu1 %v2429_v61  ;;  %v1166_v59 = vld [vmem:[#allocation10 + $0x230] sm:$0xff]  ;;  %v1163_v60 = vld [vmem:[#allocation10 + $0x218] sm:$0xff] }
 0x1ac   :  { %v1167_v61 = vld [vmem:[#allocation10 + $0x238] sm:$0xff]  ;;  %v2491_v0 = vcombine.high %v1162_v58, %v1166_v59 }
 0x1ad   :  { %v2493_v1 = vcombine.high %v1163_v60, %v1167_v61 }
 0x1ae   :  { %2007 = vmatpush1.bf16.msra.mxu0 %v2426_v2  ;;  %2050 = vmatpush1.bf16.msra.mxu1 %v2428_v3  ;;  %v2490_v2 = vcombine.low %v1162_v58, %v1166_v59  ;;  %v2492_v3 = vcombine.low %v1163_v60, %v1167_v61 }
 0x1af   :  { %2008 = vmatprep.subr.bf16.mxu0 %v2547_v4  ;;  %2051 = vmatprep.subr.bf16.mxu1 %v2549_v5 }
 0x1b2   :  { %2009 = vmatpush2.bf16.msra.mxu0 %v2546_v11  ;;  %2052 = vmatpush2.bf16.msra.mxu1 %v2548_v12 }
 0x1b3   :  { %2010 = vmatprep.subr.bf16.mxu0 %v2539_v13  ;;  %2053 = vmatprep.subr.bf16.mxu1 %v2541_v14  ;;  %v1224_v13 = vld [vmem:[%s3056_s5] sm:$0xff] }
 0x1b4   :  { %v1233_v14 = vrot.slane %v1224_v13, %v234_v28  ;;  %v1229_v15 = vrot.slane %v1224_v13, %v230_v30 }
 0x1b6   :  { %2011 = vmatpush2.bf16.msra.mxu0 %v2538_v26  ;;  %2054 = vmatpush2.bf16.msra.mxu1 %v2540_v27  ;;  %v1240_v26 = vsub.s32 3, %v2998_v25 }
 0x1b7   :  { %2012 = vmatprep.subr.bf16.mxu0 %v2531_v29  ;;  %2055 = vmatprep.subr.bf16.mxu1 %v2533_v31 }
 0x1b8   :  { %v1241_v16 = vrot.slane %v1224_v13, %v1240_v26  ;;  %v2176_v26 = vld [vmem:[#allocation5 + $0x10] sm:$0xff] }
 0x1ba   :  { %2013 = vmatpush2.bf16.msra.mxu0 %v2530_v21  ;;  %2056 = vmatpush2.bf16.msra.mxu1 %v2532_v22 }
 0x1bb   :  { %2014 = vmatprep.subr.bf16.mxu0 %v2523_v32  ;;  %2057 = vmatprep.subr.bf16.mxu1 %v2525_v33  ;;  %v1244_v32 = vsub.s32 4, %v2998_v25  ;;  %v1252_v33 = vsub.s32 6, %v2998_v25 }
 0x1bd   :  { %v1245_v37 = vrot.slane %v1224_v13, %v1244_v32 }
 0x1be   :  { %2015 = vmatpush2.bf16.msra.mxu0 %v2522_v38  ;;  %2058 = vmatpush2.bf16.msra.mxu1 %v2524_v39  ;;  %v1253_v38 = vrot.slane %v1224_v13, %v1252_v33  ;;  %v2180_v33 = vld [vmem:[#allocation5 + $0x30] sm:$0xff] }
 0x1bf   :  { %2016 = vmatprep.subr.bf16.mxu0 %v2515_v40  ;;  %2059 = vmatprep.subr.bf16.mxu1 %v2517_v41  ;;  %v1249_v40 = vrot.slane %v1224_v13, %v1248_v34  ;;  %v1257_v41 = vrot.slane %v1224_v13, %v1256_v35 }
 0x1c2   :  { %2017 = vmatpush2.bf16.msra.mxu0 %v2514_v46  ;;  %2060 = vmatpush2.bf16.msra.mxu1 %v2516_v47 }
 0x1c3   :  { %2018 = vmatprep.subr.bf16.mxu0 %v2507_v48  ;;  %2061 = vmatprep.subr.bf16.mxu1 %v2509_v49 }
 0x1c6   :  { %2019 = vmatpush2.bf16.msra.mxu0 %v2506_v54  ;;  %2062 = vmatpush2.bf16.msra.mxu1 %v2508_v55 }
 0x1c7   :  { %2020 = vmatprep.subr.bf16.mxu0 %v2499_v56  ;;  %2063 = vmatprep.subr.bf16.mxu1 %v2501_v57 }
 0x1ca   :  { %2021 = vmatpush2.bf16.msra.mxu0 %v2498_v62  ;;  %2064 = vmatpush2.bf16.msra.mxu1 %v2500_v63 }
 0x1cb   :  { %2022 = vmatprep.subr.bf16.mxu0 %v2491_v0  ;;  %2065 = vmatprep.subr.bf16.mxu1 %v2493_v1 }
 0x1ce   :  { %2023 = vmatpush2.bf16.msra.mxu0 %v2490_v2  ;;  %2066 = vmatpush2.bf16.msra.mxu1 %v2492_v3 }
 0x1d1   :  { %2025 = vmatmul.mubr.bf16.vlgmr.msra.gmra.mxu0 %v3006_v8  ;;  %2068 = vmatmul.mubr.bf16.vlgmr.msra.gmra.mxu1 %v3006_v8  ;;  %v1236_v8 = vsub.s32 2, %v2998_v25 }
 0x1d3   :  { %v1237_v24 = vrot.slane %v1224_v13, %v1236_v8 }
 0x251   :  { %v1940_v4 = vpop.f32.mrf.mxu0  ;;  %v1983_v5 = vpop.f32.mrf.mxu1 }
 0x252   :  { %v1941_v23 = vadd.f32 %v1940_v4, %v1229_v15  ;;  %v1984_v31 = vadd.f32 %v1983_v5, %v1237_v24  ;;  %v2175_v5 = vld [vmem:[#allocation5 + $0x8] sm:$0xff] }
 0x253   :  { %v1942_v6 = vpop.f32.mrf.mxu0  ;;  %v1985_v7 = vpop.f32.mrf.mxu1 }
 0x254   :  { %v1943_v19 = vadd.f32 %v1942_v6, %v1233_v14  ;;  %v2078_v29 = vsub.f32 0.0, %v1941_v23  ;;  %v2080_v20 = vsub.f32 0.0, %v1984_v31  ;;  %v1986_v21 = vadd.f32 %v1985_v7, %v1241_v16 }
 0x255   :  { %v1944_v9 = vpop.f32.mrf.mxu0  ;;  %v1987_v10 = vpop.f32.mrf.mxu1 }
 0x256   :  { %v2079_v27 = vsub.f32 0.0, %v1943_v19  ;;  %v2094_v18 = vmul.f32 1.442695, %v2078_v29  ;;  %v2098_v28 = vmul.f32 1.442695, %v2080_v20  ;;  %v2081_v22 = vsub.f32 0.0, %v1986_v21 }
 0x257   :  { %v1946_v11 = vpop.f32.mrf.mxu0  ;;  %v1989_v12 = vpop.f32.mrf.mxu1  ;;  %v2174_v9 = vld [vmem:[#allocation5] sm:$0xff] }
 0x258   :  { %v2096_v17 = vmul.f32 1.442695, %v2079_v27  ;;  %v2100_v30 = vmul.f32 1.442695, %v2081_v22 }
 0x25a   :  { %2756 = vpow2.f32 %v2096_v17  ;;  %v2177_v17 = vld [vmem:[#allocation5 + $0x18] sm:$0xff] }
 0x25b   :  { %2758 = vpow2.f32 %v2094_v18 }
 0x25c   :  { %2760 = vpow2.f32 %v2098_v28 }
 0x25d   :  { %2762 = vpow2.f32 %v2100_v30  ;;  %v2178_v30 = vld [vmem:[#allocation5 + $0x20] sm:$0xff] }
 0x267   :  { %v2757_v36 = vpop.eup %2756 }
 0x268   :  { %v2759_v39 = vpop.eup %2758  ;;  %v2127_v42 = vadd.f32 1.0, %v2757_v36  ;;  %v2179_v36 = vld [vmem:[#allocation5 + $0x28] sm:$0xff] }
 0x269   :  { %v2126_v47 = vadd.f32 1.0, %v2759_v39  ;;  %v2761_v54 = vpop.eup %2760  ;;  %v2181_v39 = vld [vmem:[#allocation5 + $0x38] sm:$0xff] }
 0x26a   :  { %2764 = vrcp.f32 %v2127_v42  ;;  %v2128_v63 = vadd.f32 1.0, %v2761_v54  ;;  %v2763_v2 = vpop.eup %2762 }
 0x26b   :  { %2766 = vrcp.f32 %v2126_v47  ;;  %v2129_v3 = vadd.f32 1.0, %v2763_v2 }
 0x277   :  { %v2765_v4 = vpop.eup %2764 }
 0x278   :  { %v2767_v6 = vpop.eup %2766  ;;  %v2191_v12 = vsub.f32 %v2175_v5, %v2765_v4 }
 0x279   :  { %v2190_v19 = vsub.f32 %v2174_v9, %v2767_v6 }
 0x27a   :  { %v2212_v27 = vsel %vm2209_vm0, %v2191_v12, 0.0 }
 0x27b   :  { %v2211_v31 = vsel %vm2209_vm0, %v2190_v19, 0.0  ;;  %v2228_v18 = vmul.f32 %v2212_v27, %v2212_v27 }
 0x27c   :  { %v2227_v20 = vmul.f32 %v2211_v31, %v2211_v31 }
 0x27e   :  { %v2243_v22 = vadd.f32 %v2228_v18, %v2227_v20 }
 0x291   :  { %v2026_v43 = vpop.f32.mrf.mxu0  ;;  %v2069_v44 = vpop.f32.mrf.mxu1 }
 0x292   :  { %v2027_v45 = vadd.f32 %v2026_v43, %v1245_v37  ;;  %v2070_v46 = vadd.f32 %v2069_v44, %v1253_v38 }
 0x293   :  { %v2028_v48 = vpop.f32.mrf.mxu0  ;;  %v2071_v49 = vpop.f32.mrf.mxu1 }
 0x294   :  { %v2082_v50 = vsub.f32 0.0, %v2027_v45  ;;  %v2084_v51 = vsub.f32 0.0, %v2070_v46  ;;  %v2029_v52 = vadd.f32 %v2028_v48, %v1249_v40  ;;  %v2072_v53 = vadd.f32 %v2071_v49, %v1257_v41 }
 0x295   :  { %v2030_v55 = vpop.f32.mrf.mxu0  ;;  %v2073_v56 = vpop.f32.mrf.mxu1 }
 0x296   :  { %v2102_v57 = vmul.f32 1.442695, %v2082_v50  ;;  %v2106_v58 = vmul.f32 1.442695, %v2084_v51  ;;  %v2083_v59 = vsub.f32 0.0, %v2029_v52  ;;  %v2085_v60 = vsub.f32 0.0, %v2072_v53 }
 0x297   :  { %v2032_v61 = vpop.f32.mrf.mxu0  ;;  %v2075_v62 = vpop.f32.mrf.mxu1 }
 0x298   :  { %2768 = vpow2.f32 %v2102_v57  ;;  %v2104_v0 = vmul.f32 1.442695, %v2083_v59  ;;  %v2108_v1 = vmul.f32 1.442695, %v2085_v60 }
 0x299   :  { %2770 = vpow2.f32 %v2106_v58 }
 0x29a   :  { %2772 = vpow2.f32 %v2104_v0 }
 0x29b   :  { %2774 = vpow2.f32 %v2108_v1 }
 0x29c   :  { %2776 = vrcp.f32 %v2128_v63 }
 0x29d   :  { %2778 = vrcp.f32 %v2129_v3 }
 0x2a5   :  { %v2769_v7 = vpop.eup %2768 }
 0x2a6   :  { %v2771_v10 = vpop.eup %2770  ;;  %v2130_v11 = vadd.f32 1.0, %v2769_v7 }
 0x2a7   :  { %v2773_v13 = vpop.eup %2772  ;;  %v2132_v14 = vadd.f32 1.0, %v2771_v10 }
 0x2a8   :  { %v2775_v15 = vpop.eup %2774  ;;  %2780 = vrcp.f32 %v2130_v11  ;;  %v2131_v8 = vadd.f32 1.0, %v2773_v13 }
 0x2a9   :  { %v2777_v23 = vpop.eup %2776  ;;  %2782 = vrcp.f32 %v2132_v14  ;;  %v2133_v24 = vadd.f32 1.0, %v2775_v15 }
 0x2aa   :  { %2784 = vrcp.f32 %v2131_v8  ;;  %v2192_v29 = vsub.f32 %v2176_v26, %v2777_v23  ;;  %v2779_v16 = vpop.eup %2778 }
 0x2ab   :  { %2786 = vrcp.f32 %v2133_v24  ;;  %v2193_v21 = vsub.f32 %v2177_v17, %v2779_v16 }
 0x2ac   :  { %v2213_v28 = vsel %vm2209_vm0, %v2192_v29, 0.0 }
 0x2ad   :  { %v2229_v32 = vmul.f32 %v2213_v28, %v2213_v28  ;;  %v2214_v34 = vsel %vm2209_vm0, %v2193_v21, 0.0 }
 0x2ae   :  { %v2230_v43 = vmul.f32 %v2214_v34, %v2214_v34 }
 0x2af   :  { %v2244_v37 = vadd.f32 %v2243_v22, %v2229_v32 }
 0x2b1   :  { %v2245_v49 = vadd.f32 %v2244_v37, %v2230_v43 }
 0x2b5   :  { %v2781_v35 = vpop.eup %2780 }
 0x2b6   :  { %v2783_v38 = vpop.eup %2782  ;;  %v2194_v40 = vsub.f32 %v2178_v30, %v2781_v35 }
 0x2b7   :  { %v2785_v41 = vpop.eup %2784  ;;  %v2196_v42 = vsub.f32 %v2180_v33, %v2783_v38 }
 0x2b8   :  { %v2787_v44 = vpop.eup %2786  ;;  %v2195_v45 = vsub.f32 %v2179_v36, %v2785_v41  ;;  %v2215_v46 = vsel %vm2209_vm0, %v2194_v40, 0.0 }
 0x2b9   :  { %v2197_v47 = vsub.f32 %v2181_v39, %v2787_v44  ;;  %v2231_v48 = vmul.f32 %v2215_v46, %v2215_v46  ;;  %v2217_v51 = vsel %vm2209_vm0, %v2196_v42, 0.0 }
 0x2ba   :  { %v2216_v50 = vsel %vm2209_vm0, %v2195_v45, 0.0  ;;  %v2233_v55 = vmul.f32 %v2217_v51, %v2217_v51 }
 0x2bb   :  { %v2232_v52 = vmul.f32 %v2216_v50, %v2216_v50  ;;  %v2246_v53 = vadd.f32 %v2245_v49, %v2231_v48  ;;  %v2218_v54 = vsel %vm2209_vm0, %v2197_v47, 0.0 }
 0x2bc   :  { %v2234_v57 = vmul.f32 %v2218_v54, %v2218_v54 }
 0x2bd   :  { %v2247_v56 = vadd.f32 %v2246_v53, %v2232_v52 }
 0x2bf   :  { %v2248_v58 = vadd.f32 %v2247_v56, %v2233_v55 }
 0x2c1   :  { %v2249_v59 = vadd.f32 %v2248_v58, %v2234_v57 }
 0x2c3   :  { %2258 = vadd.xlane.f32.xlu0 %v2249_v59 }
 0x34c   :  { %v2259_v60 = vpop.xlane.xlu0 %2258 }
 0x34d   :  { %v2260_v61 = vrot.slane %v2259_v60, 4 }
 0x34f   :  { %v2261_v62 = vadd.f32 %v2260_v61, %v2259_v60 }
 0x351   :  { %v2262_v63 = vrot.slane %v2261_v62, 2 }
 0x353   :  { %v2263_v0 = vadd.f32 %v2262_v63, %v2261_v62 }
 0x355   :  { %v2264_v1 = vrot.slane %v2263_v0, 1 }
 0x357   :  { %v2265_v2 = vadd.f32 %v2264_v1, %v2263_v0 }
 0x359   :  { %2550 = vpush %v2265_v2 }
 0x38a   :  { %s2551_s5 = spop %2550 }
 0x38b   :  { %s2267_s25 = smul.f32 0.00048828125, %s2551_s5 }
 0x38d   :  { %2269 = sst [smem:[#allocation11]] %s2267_s25 }
 0x38e   :  { %2277 = dma.smem_to_hbm %s2915_s26, 16, %s3057_s6, [#allocation4]  }
 0x38f   :  { %2902 = dma.done.wait [#allocation4], 16  }
 0x390   :  { %2903 = vsyncadd [#allocation4], 4294967280 }
 0x391   :  { %2281 = sfence }
 0x392   :  { %2282 = vsyncpa [#allocation3], 1 }
 0x393   :  { %2283 = vsyncpa [#allocation6], 1 }
 0x394   :  { %2284 = vsyncpa [#allocation9], 1 }
 0x395   :  { %2285 = vsyncpa [#allocation4], 1 }

</bundles_post_ra>
